<compile_context>
chip_gen: v5e
topology: v5e:2x2
jax: 0.10.0
libtpu: 0.0.40
codegen_flags: <defaults>
</compile_context>

<pallas_src>
import jax
import jax.numpy as jnp
from jax.experimental import pallas as pl
from jax.experimental.pallas import tpu as pltpu


def context_attention_kernel(x_ref, k_ref, v_ref, mask_ref, w_ref,
                             c_ref, attn_ref,
                             q_sc, m_sc, l_sc, acc_sc, scores_sc):
    s = pl.program_id(1)

    @pl.when(s == 0)
    def _init():
        # Input projection (no bias): one small MXU matmul per batch tile.
        # The weight block uses a constant index_map so it is DMA'd once and stays resident.
        q_sc[...] = jnp.dot(x_ref[...], w_ref[...],
                            preferred_element_type=jnp.float32)
        m_sc[...] = jnp.full_like(m_sc, -jnp.inf)
        l_sc[...] = jnp.zeros_like(l_sc)
        acc_sc[...] = jnp.zeros_like(acc_sc)

    k = k_ref[...]                       # [TB, TS, Dq]  keys tile
    v = v_ref[...]                       # [TB, TS, Dv]  values tile
    pad = mask_ref[...][:, :, 0]         # [TB, TS]      1.0 = padded position
    q = q_sc[...]                        # [TB, Dq]

    # Dot-product scores: VPU broadcast-multiply + lane reduction.
    scores = jnp.sum(k * q[:, None, :], axis=-1)                     # [TB, TS] f32
    scores = jnp.where(pad > 0.5, jnp.float32(-9e9), scores)         # masked_fill_ semantics

    # Stash raw (masked) scores in VMEM scratch; the whole distribution is
    # normalized once at the last src_len tile.  (Scratch persists across grid steps.)
    scores_sc[s] = scores

    # Flash-style online softmax accumulation of the context vector.
    m_prev = m_sc[...]                                               # [TB, 1]
    m_new = jnp.maximum(m_prev, jnp.max(scores, axis=-1, keepdims=True))
    alpha = jnp.exp(m_prev - m_new)                                  # [TB, 1]
    p = jnp.exp(scores - m_new)                                      # [TB, TS]
    l_sc[...] = alpha * l_sc[...] + jnp.sum(p, axis=-1, keepdims=True)

    # Context contribution: sum_t p[b,t] * v[b,t,:]  (VPU + sublane reduce; the kernel
    # is HBM-bound, so the degenerate M=1 batched MXU matmul buys nothing).
    pv = jnp.sum(p[:, :, None] * v, axis=1)                          # [TB, Dv]
    acc_sc[...] = alpha * acc_sc[...] + pv
    m_sc[...] = m_new

    @pl.when(s == pl.num_programs(1) - 1)
    def _finalize():
        inv_l = 1.0 / l_sc[...]                                      # [TB, 1] exact divide
        c_ref[...] = (acc_sc[...] * inv_l).astype(c_ref.dtype)
        m = m_sc[...]                                                # [TB, 1]
        attn_ref[...] = (jnp.exp(scores_sc[...] - m[None, :, :])
                         * inv_l[None, :, :]).astype(attn_ref.dtype)


def _pick_tile(total, target, align):
    """Largest `align`-multiple <= target that divides `total`, else the full extent."""
    if total <= target or total <= align:
        return total
    t = (min(target, total) // align) * align
    while t >= align:
        if total % t == 0:
            return t
        t -= align
    return total


def context_generating_attention(inp, source_hids, source_hidinemb,
                                 encoder_padding_mask, weight,
                                 *, block_b=None, block_s=None):
    """Pallas TPU implementation of ContextGeneratingAttentionLayer.forward.

    Args:
      inp:                   [B, Din]      decoder state
      source_hids:           [S, B, Dq]    keys
      source_hidinemb:       [S, B, Dv]    values
      encoder_padding_mask:  [S, B] bool or None (True = padded)
      weight:                [Dq, Din]     input_proj.weight (torch [out, in] layout)
    Returns:
      ctx:  [B, Dv]
      attn: [S, B]   (softmax over S)
    """
    S, B, Dq = source_hids.shape
    Dv = source_hidinemb.shape[-1]
    Din = inp.shape[-1]
    f32 = jnp.float32

    # ---- tile selection (keeps double-buffered key/value tiles well under VMEM) ----
    TB = block_b if block_b is not None else _pick_tile(B, 8, 8)
    if block_s is not None:
        TS = block_s
    else:
        bytes_per_row = max(1, TB * (Dq + Dv) * 4)
        ts_target = max(8, (4 * 1024 * 1024) // bytes_per_row)
        TS = _pick_tile(S, min(512, ts_target), 8)
    assert B % TB == 0 and S % TS == 0, (B, TB, S, TS)
    NS = S // TS

    # ---- layout plumbing: batch-first with the feature dim on lanes ----
    inp_f = inp.astype(f32)
    hids_bsd = jnp.transpose(source_hids, (1, 0, 2)).astype(f32)       # [B, S, Dq]
    vals_bsd = jnp.transpose(source_hidinemb, (1, 0, 2)).astype(f32)   # [B, S, Dv]
    if encoder_padding_mask is None:
        mask_bs1 = jnp.zeros((B, S, 1), f32)
    else:
        mask_bs1 = jnp.transpose(encoder_padding_mask, (1, 0)).astype(f32)[:, :, None]
    w_t = weight.astype(f32).T                                          # [Din, Dq]

    grid = (B // TB, NS)
    grid_spec = pltpu.PrefetchScalarGridSpec(
        num_scalar_prefetch=0,
        grid=grid,
        in_specs=[
            pl.BlockSpec((TB, Din), lambda b, s: (b, 0)),        # input (constant over S)
            pl.BlockSpec((TB, TS, Dq), lambda b, s: (b, s, 0)),  # keys tile
            pl.BlockSpec((TB, TS, Dv), lambda b, s: (b, s, 0)),  # values tile
            pl.BlockSpec((TB, TS, 1), lambda b, s: (b, s, 0)),   # padding mask tile
            pl.BlockSpec((Din, Dq), lambda b, s: (0, 0)),        # projection weight (resident)
        ],
        out_specs=(
            pl.BlockSpec((TB, Dv), lambda b, s: (b, 0)),         # context (resident over S)
            pl.BlockSpec((NS, TB, TS), lambda b, s: (0, b, 0)),  # attn (written once, at last S tile)
        ),
        scratch_shapes=[
            pltpu.VMEM((TB, Dq), f32),      # projected query
            pltpu.VMEM((TB, 1), f32),       # running max
            pltpu.VMEM((TB, 1), f32),       # running denominator
            pltpu.VMEM((TB, Dv), f32),      # context accumulator
            pltpu.VMEM((NS, TB, TS), f32),  # raw masked scores for the batch tile
        ],
    )

    c, attn_k = pl.pallas_call(
        context_attention_kernel,
        out_shape=(
            jax.ShapeDtypeStruct((B, Dv), f32),
            jax.ShapeDtypeStruct((NS, B, TS), f32),
        ),
        grid_spec=grid_spec,
        compiler_params=pltpu.CompilerParams(
            dimension_semantics=("parallel", "arbitrary"),
            vmem_limit_bytes=32 * 1024 * 1024,
        ),
    )(inp_f, hids_bsd, vals_bsd, mask_bs1, w_t)

    attn = jnp.transpose(attn_k, (0, 2, 1)).reshape(S, B)
    return c, attn


def _reference(inp, source_hids, source_hidinemb, encoder_padding_mask, weight):
    """Pure-JAX mirror of the PyTorch forward."""
    x = inp @ weight.T                                                # [B, Dq]
    attn = jnp.sum(source_hids * x[None, :, :], axis=2)               # [S, B]
    if encoder_padding_mask is not None:
        attn = jnp.where(encoder_padding_mask, -9e9, attn)
    attn = jax.nn.softmax(attn, axis=0)
    ctx = jnp.sum(attn[:, :, None] * source_hidinemb, axis=0)         # [B, Dv]
    return ctx, attn


if __name__ == "__main__":
    S, B, Din, Dq, Dv = 32, 16, 16, 32, 64

    key = jax.random.PRNGKey(0)
    k0, k1, k2, k3, k4 = jax.random.split(key, 5)
    inp = jax.random.normal(k0, (B, Din), jnp.float32)
    source_hids = jax.random.normal(k1, (S, B, Dq), jnp.float32)
    source_hidinemb = jax.random.normal(k2, (S, B, Dv), jnp.float32)
    weight = (1.0 / (Din ** 0.5)) * jax.random.normal(k3, (Dq, Din), jnp.float32)

    lengths = jax.random.randint(k4, (B,), minval=8, maxval=S + 1)
    encoder_padding_mask = jnp.arange(S)[:, None] >= lengths[None, :]   # [S, B] bool

    # Masked path, with a non-trivial (2, 2) grid to exercise batch + src_len tiling.
    c, attn = context_generating_attention(inp, source_hids, source_hidinemb,
                                           encoder_padding_mask, weight,
                                           block_b=8, block_s=16)
    jax.block_until_ready((c, attn))
    c_ref, attn_ref = _reference(inp, source_hids, source_hidinemb,
                                 encoder_padding_mask, weight)
    assert c.shape == (B, Dv) and attn.shape == (S, B)
    assert jnp.allclose(attn, attn_ref, atol=1e-3, rtol=1e-3)
    assert jnp.allclose(c, c_ref, atol=1e-3, rtol=1e-3)

    # No-mask path with default tile selection (single src tile).
    c2, attn2 = context_generating_attention(inp, source_hids, source_hidinemb,
                                             None, weight)
    jax.block_until_ready((c2, attn2))
    c2_ref, attn2_ref = _reference(inp, source_hids, source_hidinemb, None, weight)
    assert jnp.allclose(attn2, attn2_ref, atol=1e-3, rtol=1e-3)
    assert jnp.allclose(c2, c2_ref, atol=1e-3, rtol=1e-3)

    print("KERNEL_OK")
</pallas_src>

<mosaic_0001>
module attributes {stable_mosaic.version = 11 : i64} {
  func.func @context_attention_kernel(%arg0: i32, %arg1: i32, %arg2: memref<8x16xf32, #tpu.memory_space<vmem>>, %arg3: memref<8x16x32xf32, #tpu.memory_space<vmem>>, %arg4: memref<8x16x64xf32, #tpu.memory_space<vmem>>, %arg5: memref<8x16x1xf32, #tpu.memory_space<vmem>>, %arg6: memref<16x32xf32, #tpu.memory_space<vmem>>, %arg7: memref<8x64xf32, #tpu.memory_space<vmem>>, %arg8: memref<2x8x16xf32, #tpu.memory_space<vmem>>, %arg9: memref<8x32xf32, #tpu.memory_space<vmem>>, %arg10: memref<8x1xf32, #tpu.memory_space<vmem>>, %arg11: memref<8x1xf32, #tpu.memory_space<vmem>>, %arg12: memref<8x64xf32, #tpu.memory_space<vmem>>, %arg13: memref<2x8x16xf32, #tpu.memory_space<vmem>>) attributes {dimension_semantics = [#tpu.dimension_semantics<parallel>, #tpu.dimension_semantics<arbitrary>], iteration_bounds = array<i64: 2, 2>, scalar_prefetch = 0 : i64, scratch_operands = 5 : i64, tpu.core_type = #tpu.core_type<tc>, window_params = [{transform_indices = @transform_0, window_bounds = array<i64: 8, 16>}, {transform_indices = @transform_1, window_bounds = array<i64: 8, 16, 32>}, {transform_indices = @transform_2, window_bounds = array<i64: 8, 16, 64>}, {transform_indices = @transform_3, window_bounds = array<i64: 8, 16, 1>}, {pipeline_mode = #tpu.pipeline_mode<synchronous>, transform_indices = @transform_4, window_bounds = array<i64: 16, 32>}, {transform_indices = @transform_5, window_bounds = array<i64: 8, 64>}, {transform_indices = @transform_6, window_bounds = array<i64: 2, 8, 16>}]} {
    %c0_i32 = arith.constant 0 : i32
    %0 = arith.cmpi eq, %arg1, %c0_i32 : i32
    %1 = arith.extui %0 : i1 to i32
    %c0_i32_0 = arith.constant 0 : i32
    %2 = arith.cmpi ne, %1, %c0_i32_0 : i32
    scf.if %2 {
      %c0_31 = arith.constant 0 : index
      %c0_32 = arith.constant 0 : index
      %48 = vector.load %arg2[%c0_31, %c0_32] : memref<8x16xf32, #tpu.memory_space<vmem>>, vector<8x16xf32>
      %c0_33 = arith.constant 0 : index
      %c0_34 = arith.constant 0 : index
      %49 = vector.load %arg6[%c0_33, %c0_34] : memref<16x32xf32, #tpu.memory_space<vmem>>, vector<16x32xf32>
      %cst_35 = arith.constant dense<0.000000e+00> : vector<8x32xf32>
      %50 = tpu.matmul %48, %49, %cst_35 {dimension_numbers = #tpu.dot_dimension_numbers<[1], [0], [0], [1], [0, 0, 1, 1], [], []>} : vector<8x16xf32>, vector<16x32xf32>, vector<8x32xf32> -> vector<8x32xf32>
      %c0_36 = arith.constant 0 : index
      %c0_37 = arith.constant 0 : index
      %51 = vector.load %arg9[%c0_36, %c0_37] : memref<8x32xf32, #tpu.memory_space<vmem>>, vector<8x32xf32>
      tpu.vector_store %arg9[%c0_36, %c0_37], %50 {strides = array<i32>} : memref<8x32xf32, #tpu.memory_space<vmem>>, vector<8x32xf32>,
      %cst_38 = arith.constant 0xFF800000 : f32
      %52 = vector.broadcast %cst_38 : f32 to vector<8x1xf32>
      %c0_39 = arith.constant 0 : index
      %c0_40 = arith.constant 0 : index
      %53 = vector.load %arg10[%c0_39, %c0_40] : memref<8x1xf32, #tpu.memory_space<vmem>>, vector<8x1xf32>
      tpu.vector_store %arg10[%c0_39, %c0_40], %52 {strides = array<i32>} : memref<8x1xf32, #tpu.memory_space<vmem>>, vector<8x1xf32>,
      %cst_41 = arith.constant 0.000000e+00 : f32
      %54 = vector.broadcast %cst_41 : f32 to vector<8x1xf32>
      %c0_42 = arith.constant 0 : index
      %c0_43 = arith.constant 0 : index
      %55 = vector.load %arg11[%c0_42, %c0_43] : memref<8x1xf32, #tpu.memory_space<vmem>>, vector<8x1xf32>
      tpu.vector_store %arg11[%c0_42, %c0_43], %54 {strides = array<i32>} : memref<8x1xf32, #tpu.memory_space<vmem>>, vector<8x1xf32>,
      %cst_44 = arith.constant 0.000000e+00 : f32
      %56 = vector.broadcast %cst_44 : f32 to vector<8x64xf32>
      %c0_45 = arith.constant 0 : index
      %c0_46 = arith.constant 0 : index
      %57 = vector.load %arg12[%c0_45, %c0_46] : memref<8x64xf32, #tpu.memory_space<vmem>>, vector<8x64xf32>
      tpu.vector_store %arg12[%c0_45, %c0_46], %56 {strides = array<i32>} : memref<8x64xf32, #tpu.memory_space<vmem>>, vector<8x64xf32>,
    } else {
    }
    %c0 = arith.constant 0 : index
    %c0_1 = arith.constant 0 : index
    %c0_2 = arith.constant 0 : index
    %3 = vector.load %arg3[%c0, %c0_1, %c0_2] : memref<8x16x32xf32, #tpu.memory_space<vmem>>, vector<8x16x32xf32>
    %c0_3 = arith.constant 0 : index
    %c0_4 = arith.constant 0 : index
    %c0_5 = arith.constant 0 : index
    %4 = vector.load %arg4[%c0_3, %c0_4, %c0_5] : memref<8x16x64xf32, #tpu.memory_space<vmem>>, vector<8x16x64xf32>
    %c0_6 = arith.constant 0 : index
    %c0_7 = arith.constant 0 : index
    %c0_8 = arith.constant 0 : index
    %5 = vector.load %arg5[%c0_6, %c0_7, %c0_8] : memref<8x16x1xf32, #tpu.memory_space<vmem>>, vector<8x16x1xf32>
    %6 = vector.shape_cast %5 : vector<8x16x1xf32> to vector<8x16xf32>
    %c0_9 = arith.constant 0 : index
    %c0_10 = arith.constant 0 : index
    %7 = vector.load %arg9[%c0_9, %c0_10] : memref<8x32xf32, #tpu.memory_space<vmem>>, vector<8x32xf32>
    %8 = vector.shape_cast %7 : vector<8x32xf32> to vector<8x1x32xf32>
    %9 = vector.broadcast %8 : vector<8x1x32xf32> to vector<8x16x32xf32>
    %10 = arith.mulf %3, %9 : vector<8x16x32xf32>
    %cst = arith.constant dense<0.000000e+00> : vector<8x16xf32>
    %11 = vector.multi_reduction <add>, %10, %cst [2] : vector<8x16x32xf32> to vector<8x16xf32>
    %cst_11 = arith.constant 5.000000e-01 : f32
    %12 = vector.broadcast %cst_11 : f32 to vector<8x16xf32>
    %13 = arith.cmpf ogt, %6, %12 : vector<8x16xf32>
    %cst_12 = arith.constant -8.99999948E+9 : f32
    %14 = vector.broadcast %cst_12 : f32 to vector<8x16xf32>
    %15 = arith.select %13, %14, %11 : vector<8x16xi1>, vector<8x16xf32>
    %16 = arith.index_cast %arg1 : i32 to index
    %c0_13 = arith.constant 0 : index
    %c0_14 = arith.constant 0 : index
    %17 = vector.load %arg13[%16, %c0_13, %c0_14] : memref<2x8x16xf32, #tpu.memory_space<vmem>>, vector<1x8x16xf32>
    %18 = vector.shape_cast %17 : vector<1x8x16xf32> to vector<8x16xf32>
    %19 = vector.shape_cast %15 : vector<8x16xf32> to vector<1x8x16xf32>
    tpu.vector_store %arg13[%16, %c0_13, %c0_14], %19 {strides = array<i32>} : memref<2x8x16xf32, #tpu.memory_space<vmem>>, vector<1x8x16xf32>,
    %c0_15 = arith.constant 0 : index
    %c0_16 = arith.constant 0 : index
    %20 = vector.load %arg10[%c0_15, %c0_16] : memref<8x1xf32, #tpu.memory_space<vmem>>, vector<8x1xf32>
    %cst_17 = arith.constant dense<0xFF800000> : vector<8xf32>
    %21 = vector.multi_reduction <maximumf>, %15, %cst_17 [1] : vector<8x16xf32> to vector<8xf32>
    %22 = vector.shape_cast %21 : vector<8xf32> to vector<8x1xf32>
    %23 = arith.maximumf %20, %22 : vector<8x1xf32>
    %24 = arith.subf %20, %23 : vector<8x1xf32>
    %25 = math.exp %24 : vector<8x1xf32>
    %26 = vector.broadcast %23 : vector<8x1xf32> to vector<8x16xf32>
    %27 = arith.subf %15, %26 : vector<8x16xf32>
    %28 = math.exp %27 : vector<8x16xf32>
    %c0_18 = arith.constant 0 : index
    %c0_19 = arith.constant 0 : index
    %29 = vector.load %arg11[%c0_18, %c0_19] : memref<8x1xf32, #tpu.memory_space<vmem>>, vector<8x1xf32>
    %30 = arith.mulf %25, %29 : vector<8x1xf32>
    %cst_20 = arith.constant dense<0.000000e+00> : vector<8xf32>
    %31 = vector.multi_reduction <add>, %28, %cst_20 [1] : vector<8x16xf32> to vector<8xf32>
    %32 = vector.shape_cast %31 : vector<8xf32> to vector<8x1xf32>
    %33 = arith.addf %30, %32 : vector<8x1xf32>
    %c0_21 = arith.constant 0 : index
    %c0_22 = arith.constant 0 : index
    %34 = vector.load %arg11[%c0_21, %c0_22] : memref<8x1xf32, #tpu.memory_space<vmem>>, vector<8x1xf32>
    tpu.vector_store %arg11[%c0_21, %c0_22], %33 {strides = array<i32>} : memref<8x1xf32, #tpu.memory_space<vmem>>, vector<8x1xf32>,
    %35 = vector.shape_cast %28 : vector<8x16xf32> to vector<8x16x1xf32>
    %36 = vector.broadcast %35 : vector<8x16x1xf32> to vector<8x16x64xf32>
    %37 = arith.mulf %36, %4 : vector<8x16x64xf32>
    %cst_23 = arith.constant dense<0.000000e+00> : vector<8x64xf32>
    %38 = vector.multi_reduction <add>, %37, %cst_23 [1] : vector<8x16x64xf32> to vector<8x64xf32>
    %c0_24 = arith.constant 0 : index
    %c0_25 = arith.constant 0 : index
    %39 = vector.load %arg12[%c0_24, %c0_25] : memref<8x64xf32, #tpu.memory_space<vmem>>, vector<8x64xf32>
    %40 = vector.broadcast %25 : vector<8x1xf32> to vector<8x64xf32>
    %41 = arith.mulf %40, %39 : vector<8x64xf32>
    %42 = arith.addf %41, %38 : vector<8x64xf32>
    %c0_26 = arith.constant 0 : index
    %c0_27 = arith.constant 0 : index
    %43 = vector.load %arg12[%c0_26, %c0_27] : memref<8x64xf32, #tpu.memory_space<vmem>>, vector<8x64xf32>
    tpu.vector_store %arg12[%c0_26, %c0_27], %42 {strides = array<i32>} : memref<8x64xf32, #tpu.memory_space<vmem>>, vector<8x64xf32>,
    %c0_28 = arith.constant 0 : index
    %c0_29 = arith.constant 0 : index
    %44 = vector.load %arg10[%c0_28, %c0_29] : memref<8x1xf32, #tpu.memory_space<vmem>>, vector<8x1xf32>
    tpu.vector_store %arg10[%c0_28, %c0_29], %23 {strides = array<i32>} : memref<8x1xf32, #tpu.memory_space<vmem>>, vector<8x1xf32>,
    %c1_i32 = arith.constant 1 : i32
    %45 = arith.cmpi eq, %arg1, %c1_i32 : i32
    %46 = arith.extui %45 : i1 to i32
    %c0_i32_30 = arith.constant 0 : i32
    %47 = arith.cmpi ne, %46, %c0_i32_30 : i32
    scf.if %47 {
      %c0_31 = arith.constant 0 : index
      %c0_32 = arith.constant 0 : index
      %48 = vector.load %arg11[%c0_31, %c0_32] : memref<8x1xf32, #tpu.memory_space<vmem>>, vector<8x1xf32>
      %cst_33 = arith.constant 1.000000e+00 : f32
      %49 = vector.broadcast %cst_33 : f32 to vector<8x1xf32>
      %50 = arith.divf %49, %48 : vector<8x1xf32>
      %c0_34 = arith.constant 0 : index
      %c0_35 = arith.constant 0 : index
      %51 = vector.load %arg12[%c0_34, %c0_35] : memref<8x64xf32, #tpu.memory_space<vmem>>, vector<8x64xf32>
      %52 = vector.broadcast %50 : vector<8x1xf32> to vector<8x64xf32>
      %53 = arith.mulf %51, %52 : vector<8x64xf32>
      %c0_36 = arith.constant 0 : index
      %c0_37 = arith.constant 0 : index
      %54 = vector.load %arg7[%c0_36, %c0_37] : memref<8x64xf32, #tpu.memory_space<vmem>>, vector<8x64xf32>
      tpu.vector_store %arg7[%c0_36, %c0_37], %53 {strides = array<i32>} : memref<8x64xf32, #tpu.memory_space<vmem>>, vector<8x64xf32>,
      %c0_38 = arith.constant 0 : index
      %c0_39 = arith.constant 0 : index
      %55 = vector.load %arg10[%c0_38, %c0_39] : memref<8x1xf32, #tpu.memory_space<vmem>>, vector<8x1xf32>
      %c0_40 = arith.constant 0 : index
      %c0_41 = arith.constant 0 : index
      %c0_42 = arith.constant 0 : index
      %56 = vector.load %arg13[%c0_40, %c0_41, %c0_42] : memref<2x8x16xf32, #tpu.memory_space<vmem>>, vector<2x8x16xf32>
      %57 = vector.shape_cast %55 : vector<8x1xf32> to vector<1x8x1xf32>
      %58 = vector.broadcast %57 : vector<1x8x1xf32> to vector<2x8x16xf32>
      %59 = arith.subf %56, %58 : vector<2x8x16xf32>
      %60 = math.exp %59 : vector<2x8x16xf32>
      %61 = vector.shape_cast %50 : vector<8x1xf32> to vector<1x8x1xf32>
      %62 = vector.broadcast %61 : vector<1x8x1xf32> to vector<2x8x16xf32>
      %63 = arith.mulf %60, %62 : vector<2x8x16xf32>
      %c0_43 = arith.constant 0 : index
      %c0_44 = arith.constant 0 : index
      %c0_45 = arith.constant 0 : index
      %64 = vector.load %arg8[%c0_43, %c0_44, %c0_45] : memref<2x8x16xf32, #tpu.memory_space<vmem>>, vector<2x8x16xf32>
      tpu.vector_store %arg8[%c0_43, %c0_44, %c0_45], %63 {strides = array<i32>} : memref<2x8x16xf32, #tpu.memory_space<vmem>>, vector<2x8x16xf32>,
    } else {
    }
    return
  }
  func.func @transform_0(%arg0: i32, %arg1: i32) -> (i32, i32) {
    %c0_i32 = arith.constant 0 : i32
    %c0_i32_0 = arith.constant 0 : i32
    return %arg0, %c0_i32 : i32, i32
  }
  func.func @transform_1(%arg0: i32, %arg1: i32) -> (i32, i32, i32) {
    %c0_i32 = arith.constant 0 : i32
    %c0_i32_0 = arith.constant 0 : i32
    return %arg0, %arg1, %c0_i32 : i32, i32, i32
  }
  func.func @transform_2(%arg0: i32, %arg1: i32) -> (i32, i32, i32) {
    %c0_i32 = arith.constant 0 : i32
    %c0_i32_0 = arith.constant 0 : i32
    return %arg0, %arg1, %c0_i32 : i32, i32, i32
  }
  func.func @transform_3(%arg0: i32, %arg1: i32) -> (i32, i32, i32) {
    %c0_i32 = arith.constant 0 : i32
    %c0_i32_0 = arith.constant 0 : i32
    return %arg0, %arg1, %c0_i32 : i32, i32, i32
  }
  func.func @transform_4(%arg0: i32, %arg1: i32) -> (i32, i32) {
    %c0_i32 = arith.constant 0 : i32
    %c0_i32_0 = arith.constant 0 : i32
    %c0_i32_1 = arith.constant 0 : i32
    return %c0_i32, %c0_i32_0 : i32, i32
  }
  func.func @transform_5(%arg0: i32, %arg1: i32) -> (i32, i32) {
    %c0_i32 = arith.constant 0 : i32
    %c0_i32_0 = arith.constant 0 : i32
    return %arg0, %c0_i32 : i32, i32
  }
  func.func @transform_6(%arg0: i32, %arg1: i32) -> (i32, i32, i32) {
    %c0_i32 = arith.constant 0 : i32
    %c0_i32_0 = arith.constant 0 : i32
    %c0_i32_1 = arith.constant 0 : i32
    return %c0_i32, %arg0, %c0_i32_0 : i32, i32, i32
  }
}

</mosaic_0001>

<bundles_post_ra>
// kernel: tpu_custom_call.1
= control target key start
LH: loop header
LB: loop body
LE: loop exit
PB: predicated region body
PF: predicated region fallthrough
CT: control target
= control target key end

     0   :  { %s2564_s0 = inlined_call_operand.vmem [shape: f32[16,16], index: 0, kind: input, shape index: {}]   ;;  %s2565_s1 = inlined_call_operand.vmem [shape: f32[16,32,32], index: 1, kind: input, shape index: {}]   ;;  %s2566_s2 = inlined_call_operand.hbm [shape: f32[16,32,64], index: 2, kind: input, shape index: {}]   ;;  %s2567_s3 = inlined_call_operand.vmem [shape: f32[16,32,1], index: 3, kind: input, shape index: {}]   ;;  %s2568_s4 = inlined_call_operand.hbm [shape: f32[16,32], index: 4, kind: input, shape index: {}]   ;;  %s2569_s5 = inlined_call_operand.hbm [shape: f32[16,64], index: 5, kind: output, shape index: {0}]   ;;  %s2570_s6 = inlined_call_operand.hbm [shape: f32[2,16,16], index: 6, kind: output, shape index: {1}]  }
   0x1   :  { %2577 = sst [smem:[#allocation31_spill]] %s2565_s1 }
   0x2   :  { %2578 = sst [smem:[#allocation32_spill]] %s2566_s2 }
   0x3   :  { %2579 = sst [smem:[#allocation33_spill]] %s2568_s4 }
   0x4   :  { %2580 = sst [smem:[#allocation34_spill]] %s2570_s6 }
   0x5   :  { %12 = vsyncpa [#allocation9], 0 }
   0x6   :  { %14 = vsyncpa [#allocation9 + $0x1], 0 }
   0x7   :  { %15 = vsyncpa [#allocation13], 0 }
   0x8   :  { %16 = vsyncpa [#allocation10], 0 }
   0x9   :  { %18 = vsyncpa [#allocation10 + $0x1], 0 }
   0xa   :  { %19 = vsyncpa [#allocation16], 0 }
   0xb   :  { %21 = vsyncpa [#allocation16 + $0x1], 0  ;;  %s1966_s21 = smov 0   ;;  %s1968_s22 = smov 0  }
   0xc   :  { %s1970_s23 = smov 0   ;;  %s1972_s24 = smov 0  }
   0xd   :  { %s1974_s25 = smov 0   ;;  %s1976_s26 = smov 0  }
   0xe   :  { %s1978_s27 = smov 0   ;;  %s1980_s28 = smov 0  }
   0xf   :  { %s1982_s29 = smov 0   ;;  %s1984_s30 = smov 0  }
  0x10   :  { %s1986_s7 = smov 0  }
  0x11 LB: > { %2581 = sst [smem:[#allocation24_spill]] %s1873_s21  ;;  %s1503_s8 = sadd.s32 4294967295, %s1913_s7   ;;  %s1913_s7 = sphi %s1986_s7, %s27_s7   ;;  %s1909_s30 = sphi %s1984_s30, %s2613_s30   ;;  %s1905_s29 = sphi %s1982_s29, %s2612_s29   ;;  %s1901_s28 = sphi %s1980_s28, %s2611_s28   ;;  %s1897_s27 = sphi %s1978_s27, %s2610_s27   ;;  %s1893_s26 = sphi %s1976_s26, %s2609_s26   ;;  %s1889_s25 = sphi %s1974_s25, %s2608_s25   ;;  %s1885_s24 = sphi %s1972_s24, %s2607_s24   ;;  %s1881_s23 = sphi %s1970_s23, %s2601_s23   ;;  %s1877_s22 = sphi %s1968_s22, %s2606_s22   ;;  %s1873_s21 = sphi %s1966_s21, %s2605_s21  }
  0x12   : > { %2582 = sst [smem:[#allocation25_spill]] %s1881_s23  ;;  %s1504_s9 = sadd.s32 4294967294, %s1913_s7  }
  0x13   : > { %s36_s10 = sadd.s32 1, %s1905_s29  ;;  %s39_s11 = sadd.s32 1, %s1909_s30 }
  0x14   : > { %p37_p0 = scmp.ge.s32.totalorder %s36_s10, 2  ;;  %s74_s12 = sadd.s32 1, %s1893_s26 }
  0x15   : > { %p81_p1 = scmp.ne.s32.totalorder %s1893_s26, %s1889_s25  ;;  %p82_p2 = scmp.eq.s32.totalorder %s1913_s7, 0 }
  0x16   : > { %s2615_s10 = smov (%p37_p0, %s36_s10), 0  ;;  %s2617_s11 = smov (!%p37_p0, %s39_s11), %s1909_s30 }
  0x17   : > { %2583 = sst [smem:[#allocation26_spill]] %s2615_s10  ;;  %s70_s13 = ssub.s32 %s1905_s29, %s2615_s10 }
  0x18   : > { %p2032_p3 = por %p82_p2, %p81_p1  ;;  %p41_p4 = scmp.ge.s32.totalorder %s2617_s11, 2 }
  0x19   : > { %p115_p5 = scmp.ne.s32.totalorder %s1889_s25, %s1885_s24  ;;  %p2037_p6 = scmp.eq.s32.totalorder %s1503_s8, 0 }
  0x1a   : > { %s177_s16 = sadd.s32 1, %s1881_s23  ;;  %s2619_s11 = smov (%p41_p4, %s2617_s11), 0 }
  0x1b   : > { %2586 = sst [smem:[#allocation27_spill]] %s2619_s11  ;;  %p2046_p7 = por %p2037_p6, %p115_p5 }
  0x1c   : > { %p187_p8 = scmp.ne.s32.totalorder %s1881_s23, %s1877_s22  ;;  %s69_s18 = ssub.s32 %s1909_s30, %s2619_s11 }
  0x1d   : > { %p188_p9 = scmp.eq.s32.totalorder %s1503_s8, 3  ;;  %s71_s19 = sor.u32 %s70_s13, %s69_s18 }
  0x1e   : > { %p175_p10 = scmp.eq.s32.totalorder %s69_s18, 0  ;;  %p72_p11 = scmp.eq.s32.totalorder %s71_s19, 0 }
  0x1f   : > { %p2054_p12 = por %p188_p9, %p187_p8  ;;  %p193_p13 = scmp.ne.s32.totalorder %s1877_s22, %s1873_s21 }
  0x20   : > { %s2059_s24 = scalar_select %p175_p10, %s1881_s23, %s177_s16  }
  0x21   : > { %s2062_s10 = scalar_select %p72_p11, %s1893_s26, %s74_s12  }
  0x22   : > { %2589 = sst [smem:[#allocation28_spill]] %s2059_s24  ;;  %p194_p0 = scmp.eq.s32.totalorder %s1504_s9, 3 }
  0x23   : > { %2590 = sst [smem:[#allocation29_spill]] %s2062_s10  ;;  %p1505_p1 = scmp.ge.s32.totalorder %s1913_s7, 1 }
  0x24   : > { %p227_p2 = scmp.lt.s32.totalorder %s1913_s7, 5  ;;  %p2068_p4 = por %p194_p0, %p193_p13 }
  0x25   : > { %s2594_s4 = sld [smem:[#allocation33_spill]]  ;;  %s1915_s12 = smov [#allocation12]  }
  0x26   : > { %s2591_s6 = scalar_select %p2068_p4, 1, 0 }
  0x27   : > { %p2072_p5 = pnand %p1505_p1, %p227_p2  ;;  %s240_s9 = sshll.u32 %s1915_s12, 4  ;;  %s241_s9 = int_to_ptr.vmem [resolvable:$true] %s240_s9 }
  0x28   : > { %2592 = sst [smem:[#allocation30_spill]] %s2591_s6  ;;  %s1916_s19 = smov 128  }
  0x29   : > { %p1563_p8 = pneg %p2072_p5  ;;  %s1917_s11 = smov 8  }
  0x2a   : > { %p1507_p10 = scmp.ge.s32.totalorder %s1913_s7, 4 }
  0x2b   : > { %s238_s16 = sshll.u32 %s2594_s4, 4  ;;  %p1564_p9 = pnand %p1563_p8, %p2037_p6  ;;  %s239_s16 = int_to_ptr.hbm [resolvable:$true] %s238_s16 }
  0x2c   : > { %250 = sbr.rel (%p1507_p10) target bundleno = 109 (0x6d), region = 20 }
  0x2d   : > { %1566 = dma.hbm_to_vmem [thread:$0]  (!%p1564_p9), %s239_s16, 256, %s241_s9, [#allocation13], %s1916_s19, %s1916_s19, %s1917_s11  }
  0x31   : > { %260 = sbr.rel (!%p2032_p3) target bundleno = 75 (0x4b), region = 28  ;;  %s262_s13 = sand.u32 (%p2032_p3), 1, %s1893_s26  }
  0x32   : > { %s1510_s18 = sshll.u32 (%p2032_p3), %s1905_s29, 1  ;;  %s1508_s4 = sshll.u32 (%p2032_p3), %s262_s13, 7 }
  0x33   : > { %s1543_s10 = sshll.u32 (%p2032_p3), %s1909_s30, 5  ;;  %s2595_s1 = sld [smem:[#allocation31_spill]] (%p2032_p3) }
  0x34   : > { %s268_s12 = sadd.s32 (%p2032_p3), %s1543_s10, %s1510_s18  ;;  %s264_s10 = scalar_lea.vmem (%p2032_p3), [#allocation7], %s1508_s4 }
  0x35   : > { %s1512_s24 = sshll.u32 (%p2032_p3), %s268_s12, 3 }
  0x39   : > { %s2092_s21 = scalar_lea.vmem %s2595_s1, %s1512_s24 }
  0x3a   : > { %v329_v0 = vld [vmem:[%s2092_s21] sm:$0xff]  ;;  %v331_v1 = vld [vmem:[%s2092_s21 + $0x8] sm:$0xff] }
  0x3b   : > { %v333_v2 = vld [vmem:[%s2092_s21 + $0x20] sm:$0xff]  ;;  %330 = vst [vmem:[%s264_s10] sm:$0xff] %v329_v0  ;;  %v335_v3 = vld [vmem:[%s2092_s21 + $0x28] sm:$0xff] }
  0x3c   : > { %332 = vst [vmem:[%s264_s10 + $0x8] sm:$0xff] %v331_v1  ;;  %v337_v4 = vld [vmem:[%s2092_s21 + $0x40] sm:$0xff]  ;;  %v339_v5 = vld [vmem:[%s2092_s21 + $0x48] sm:$0xff] }
  0x3d   : > { %334 = vst [vmem:[%s264_s10 + $0x10] sm:$0xff] %v333_v2  ;;  %v341_v6 = vld [vmem:[%s2092_s21 + $0x60] sm:$0xff]  ;;  %v343_v7 = vld [vmem:[%s2092_s21 + $0x68] sm:$0xff] }
  0x3e   : > { %336 = vst [vmem:[%s264_s10 + $0x18] sm:$0xff] %v335_v3  ;;  %v345_v8 = vld [vmem:[%s2092_s21 + $0x80] sm:$0xff]  ;;  %v347_v9 = vld [vmem:[%s2092_s21 + $0x88] sm:$0xff] }
  0x3f   : > { %338 = vst [vmem:[%s264_s10 + $0x20] sm:$0xff] %v337_v4  ;;  %v349_v10 = vld [vmem:[%s2092_s21 + $0xa0] sm:$0xff]  ;;  %v351_v11 = vld [vmem:[%s2092_s21 + $0xa8] sm:$0xff] }
  0x40   : > { %340 = vst [vmem:[%s264_s10 + $0x28] sm:$0xff] %v339_v5  ;;  %v353_v12 = vld [vmem:[%s2092_s21 + $0xc0] sm:$0xff]  ;;  %v355_v13 = vld [vmem:[%s2092_s21 + $0xc8] sm:$0xff] }
  0x41   : > { %342 = vst [vmem:[%s264_s10 + $0x30] sm:$0xff] %v341_v6  ;;  %v357_v14 = vld [vmem:[%s2092_s21 + $0xe0] sm:$0xff]  ;;  %v359_v15 = vld [vmem:[%s2092_s21 + $0xe8] sm:$0xff] }
  0x42   : > { %344 = vst [vmem:[%s264_s10 + $0x38] sm:$0xff] %v343_v7 }
  0x43   : > { %346 = vst [vmem:[%s264_s10 + $0x40] sm:$0xff] %v345_v8 }
  0x44   : > { %348 = vst [vmem:[%s264_s10 + $0x48] sm:$0xff] %v347_v9 }
  0x45   : > { %350 = vst [vmem:[%s264_s10 + $0x50] sm:$0xff] %v349_v10 }
  0x46   : > { %352 = vst [vmem:[%s264_s10 + $0x58] sm:$0xff] %v351_v11 }
  0x47   : > { %354 = vst [vmem:[%s264_s10 + $0x60] sm:$0xff] %v353_v12 }
  0x48   : > { %356 = vst [vmem:[%s264_s10 + $0x68] sm:$0xff] %v355_v13 }
  0x49   : > { %358 = vst [vmem:[%s264_s10 + $0x70] sm:$0xff] %v357_v14 }
  0x4a   : > { %360 = vst [vmem:[%s264_s10 + $0x78] sm:$0xff] %v359_v15 }
  0x4b PF: > { %s367_s4 = sand.u32 1, %s1893_s26   ;;  %s1515_s6 = sshll.u32 %s1905_s29, 1 }
  0x4c   : > { %s2112_s23 = sshll.u32 %s367_s4, 7  ;;  %s1544_s11 = sshll.u32 %s1909_s30, 5 }
  0x4d   : > { %s2115_s24 = sadd.s32 %s1544_s11, %s1515_s6  ;;  %s371_s16 = scalar_lea.vmem [#allocation8], %s2112_s23 }
  0x4e   : > { %s1517_s21 = sshll.u32 %s2115_s24, 3  ;;  %s394_s9 = sshll.u32 %s371_s16, 4  ;;  %s395_s9 = int_to_ptr.vmem [resolvable:$true] %s394_s9 }
  0x4f   : > { %s2596_s2 = sld [smem:[#allocation32_spill]]  ;;  %s1918_s10 = smov 512  }
  0x50   : > { %s1548_s12 = scalar_select %p2032_p3, [#allocation0], [#allocation19] }
  0x51   : > { %1549 = sst [smem:[#allocation18]] (%p2032_p3), %s1918_s10  ;;  %s1919_s11 = smov 256  }
  0x52   : > { %s384_s1 = sld [smem:[%s1548_s12]]   ;;  %s1920_s24 = smov 2  }
  0x53   : > { %1550 = sst [smem:[#allocation18 + $0x1]] (%p2032_p3), %s1919_s11  ;;  %s1921_s16 = smov 128  }
  0x54   : > { %1551 = sst [smem:[#allocation18 + $0x2]] (%p2032_p3), %s1920_s24  ;;  %s1922_s13 = smov 8  }
  0x55   : > { %s379_s18 = scalar_lea.hbm %s2596_s2, %s1517_s21  ;;  %1552 = sst [smem:[#allocation18 + $0x3]] (%p2032_p3), %s1921_s16 }
  0x56   : > { %s392_s6 = sshll.u32 %s379_s18, 4  ;;  %1553 = sst [smem:[#allocation18 + $0x4]] (%p2032_p3), %s1921_s16  ;;  %s393_s6 = int_to_ptr.hbm [resolvable:$true] %s392_s6 }
  0x57   : > { %1554 = sst [smem:[#allocation18 + $0x5]] (%p2032_p3), %s1922_s13  ;;  %s368_s12 = scalar_lea.sflag [#allocation9], %s367_s4 }
  0x58   : > { %s1518_s19 = sshll.u32 %s384_s1, 26  ;;  %s1923_s2 = smov [#allocation17]  }
  0x59   : > { %s1519_s10 = sadd.s32 134217728, %s1518_s19  ;;  %416 = sbr.rel (!%p2032_p3) target bundleno = 109 (0x6d), region = 70 }
  0x5a   : > { %1555 = dma.general (%p2032_p3), %s393_s6, 2048, %s395_s9, %s368_s12, %s1923_s2, [#allocation18], %s1519_s10, 0  }
  0x5b   : > { %s2143_s24 = scalar_lea.vmem (%p2032_p3), %s2567_s3, %s1517_s21  ;;  %s420_s1 = scalar_lea.vmem (%p2032_p3), [#allocation11], %s2112_s23 }
  0x5c   : > { %v485_v16 = vld [vmem:[%s2143_s24] sm:$0xff] (%p2032_p3)  ;;  %v487_v17 = vld [vmem:[%s2143_s24 + $0x8] sm:$0xff] (%p2032_p3) }
  0x5d   : > { %v489_v18 = vld [vmem:[%s2143_s24 + $0x20] sm:$0xff] (%p2032_p3)  ;;  %486 = vst [vmem:[%s420_s1] sm:$0xff] (%p2032_p3), %v485_v16  ;;  %v491_v19 = vld [vmem:[%s2143_s24 + $0x28] sm:$0xff] (%p2032_p3) }
  0x5e   : > { %488 = vst [vmem:[%s420_s1 + $0x8] sm:$0xff] %v487_v17  ;;  %v493_v20 = vld [vmem:[%s2143_s24 + $0x40] sm:$0xff]  ;;  %v495_v21 = vld [vmem:[%s2143_s24 + $0x48] sm:$0xff] }
  0x5f   : > { %490 = vst [vmem:[%s420_s1 + $0x10] sm:$0xff] %v489_v18  ;;  %v497_v22 = vld [vmem:[%s2143_s24 + $0x60] sm:$0xff]  ;;  %v499_v23 = vld [vmem:[%s2143_s24 + $0x68] sm:$0xff] }
  0x60   : > { %492 = vst [vmem:[%s420_s1 + $0x18] sm:$0xff] %v491_v19  ;;  %v501_v24 = vld [vmem:[%s2143_s24 + $0x80] sm:$0xff]  ;;  %v503_v25 = vld [vmem:[%s2143_s24 + $0x88] sm:$0xff] }
  0x61   : > { %494 = vst [vmem:[%s420_s1 + $0x20] sm:$0xff] %v493_v20  ;;  %v505_v26 = vld [vmem:[%s2143_s24 + $0xa0] sm:$0xff]  ;;  %v507_v27 = vld [vmem:[%s2143_s24 + $0xa8] sm:$0xff] }
  0x62   : > { %496 = vst [vmem:[%s420_s1 + $0x28] sm:$0xff] %v495_v21  ;;  %v509_v28 = vld [vmem:[%s2143_s24 + $0xc0] sm:$0xff]  ;;  %v511_v29 = vld [vmem:[%s2143_s24 + $0xc8] sm:$0xff] }
  0x63   : > { %498 = vst [vmem:[%s420_s1 + $0x30] sm:$0xff] %v497_v22  ;;  %v513_v30 = vld [vmem:[%s2143_s24 + $0xe0] sm:$0xff]  ;;  %v515_v31 = vld [vmem:[%s2143_s24 + $0xe8] sm:$0xff] }
  0x64   : > { %500 = vst [vmem:[%s420_s1 + $0x38] sm:$0xff] %v499_v23 }
  0x65   : > { %502 = vst [vmem:[%s420_s1 + $0x40] sm:$0xff] %v501_v24 }
  0x66   : > { %504 = vst [vmem:[%s420_s1 + $0x48] sm:$0xff] %v503_v25 }
  0x67   : > { %506 = vst [vmem:[%s420_s1 + $0x50] sm:$0xff] %v505_v26 }
  0x68   : > { %508 = vst [vmem:[%s420_s1 + $0x58] sm:$0xff] %v507_v27 }
  0x69   : > { %510 = vst [vmem:[%s420_s1 + $0x60] sm:$0xff] %v509_v28 }
  0x6a   : > { %512 = vst [vmem:[%s420_s1 + $0x68] sm:$0xff] %v511_v29 }
  0x6b   : > { %514 = vst [vmem:[%s420_s1 + $0x70] sm:$0xff] %v513_v30 }
  0x6c   : > { %516 = vst [vmem:[%s420_s1 + $0x78] sm:$0xff] %v515_v31 }
  0x6d PF: > { %525 = sbr.rel (%p2072_p5) target bundleno = 1266 (0x4f2), region = 108  ;;  %s528_s2 = sand.u32 (!%p2072_p5), 1, %s1889_s25  }
  0x6e   : > { %s1526_s14 = sshll.u32 (!%p2072_p5), %s528_s2, 7  ;;  %s535_s23 = scalar_lea.sflag (!%p2072_p5), [#allocation9], %s528_s2 }
  0x6f   : > { %s2165_s4 = scalar_lea.vmem (!%p2072_p5), [#allocation7], %s1526_s14  ;;  %s2167_s21 = scalar_lea.vmem (!%p2072_p5), [#allocation8], %s1526_s14 }
  0x72   : > { %1856 = dma.done.wait (%p2046_p7), %s535_s23, 2048  }
  0x73   : > { %1858 = vsyncadd (%p2046_p7), %s535_s23, 4294965248  ;;  %s2173_s9 = scalar_lea.vmem [#allocation11], %s1526_s14 }
  0x74   : > { %1860 = dma.done.wait (%p2037_p6), [#allocation13], 256  }
  0x75   : > { %1862 = vsyncadd (%p2037_p6), [#allocation13], 4294967040  ;;  %s2180_s8 = sand.u32 1, %s1877_s22   ;;  %p597_p3 = scmp.lt.s32.totalorder %s1901_s28, 1 }
  0x76   : > { %s1530_s6 = sshll.u32 %s2180_s8, 3  ;;  %s1531_s16 = sshll.u32 %s2180_s8, 4 }
  0x77   : > { %s598_s17 = scalar_select %p597_p3, %s1901_s28, 1 }
  0x78   : > { %s2189_s18 = scalar_lea.vmem [#allocation14], %s1530_s6  ;;  %s2191_s15 = scalar_lea.vmem [#allocation15], %s1531_s16 }
  0x79   : > { %s1532_s19 = sshll.u32 %s598_s17, 3  ;;  %p1533_p6 = scmp.ne.s32.totalorder %s1897_s27, 0 }
  0x7a   : > { %s600_s12 = scalar_lea.vmem %s2564_s0, %s1532_s19 }
  0x7b   : > { %610 = sbr.rel (%p1533_p6) target bundleno = 259 (0x103), region = 128 }
  0x80   : > { %v613_v32 = vld [vmem:[#allocation12 + $0x8] sm:$0xff]  ;;  %v612_v33 = vld [vmem:[#allocation12] sm:$0xff]  ;;  %v611_v34 = vld [vmem:[%s600_s12] sm:$0xff]  ;;  %vm614_vm0 = vcmask 130048   ;;  %vm640_vm1 = vcmask 7168   ;;  %v1924_v35 = vmov -inf  }
  0x81   : > { %632 = vmatpush.msra.mxu0 %v613_v32  ;;  %641 = vst.msk [vmem:[#allocation3] sm:$0xff] %vm640_vm1, %v1924_v35  ;;  %vm643_vm2 = vcmask 523264   ;;  %v1925_v36 = vmov 0.0   ;;  %vm638_vm3 = vcmask 261120  }
  0x82   : > { %642 = vst.msk [vmem:[#allocation4] sm:$0xff] %vm640_vm1, %v1925_v36 }
  0x83   : > { %633 = vmatpush.msra.mxu0 %v612_v33  ;;  %644 = vst.msk [vmem:[#allocation5] sm:$0xff] %vm643_vm2, %v1925_v36 }
  0x84   : > { %1534 = vmatmul.msk.f32.vlgmr.msra.gmra.mxu0 %vm614_vm0, %v611_v34 }
 0x101   : > { %v635_v37 = vpop.f32.mrf.mxu0 }
 0x102   : > { %639 = vst.msk [vmem:[#allocation2] sm:$0xff] %vm638_vm3, %v635_v37 }
 0x103 PF: > { %v645_v38 = vld [vmem:[%s2165_s4] sm:$0xff]  ;;  %vm734_vm4 = vcmask 261120   ;;  %v647_v43 = vld [vmem:[%s2165_s4 + $0x10] sm:$0xff]  ;;  %v646_v48 = vld [vmem:[%s2165_s4 + $0x8] sm:$0xff]  ;;  %s1535_s11 = sshll.u32 %s1897_s27, 3  ;;  %p1536_p7 = scmp.ne.s32.totalorder %s1897_s27, 1 }
 0x104   : > { %v649_v44 = vld [vmem:[%s2165_s4 + $0x20] sm:$0xff]  ;;  %v650_v52 = vld [vmem:[%s2165_s4 + $0x28] sm:$0xff]  ;;  %v648_v53 = vld [vmem:[%s2165_s4 + $0x18] sm:$0xff]  ;;  %s923_s24 = scalar_lea.vmem [#allocation6], %s1535_s11 }
 0x105   : > { %v651_v63 = vld [vmem:[%s2165_s4 + $0x30] sm:$0xff]  ;;  %v653_v3 = vld [vmem:[%s2165_s4 + $0x40] sm:$0xff]  ;;  %v652_v4 = vld [vmem:[%s2165_s4 + $0x38] sm:$0xff] }
 0x106   : > { %v654_v10 = vld [vmem:[%s2165_s4 + $0x48] sm:$0xff]  ;;  %v656_v14 = vld [vmem:[%s2165_s4 + $0x58] sm:$0xff]  ;;  %v655_v15 = vld [vmem:[%s2165_s4 + $0x50] sm:$0xff] }
 0x107   : > { %v657_v23 = vld [vmem:[%s2165_s4 + $0x60] sm:$0xff]  ;;  %v659_v27 = vld [vmem:[%s2165_s4 + $0x70] sm:$0xff]  ;;  %v658_v28 = vld [vmem:[%s2165_s4 + $0x68] sm:$0xff] }
 0x108   : > { %v660_v33 = vld [vmem:[%s2165_s4 + $0x78] sm:$0xff] }
 0x109   : > { %v693_v39 = vld [vmem:[#allocation2] sm:$0xff] }
 0x10a   : > { %v702_v40 = vperm.slane %v693_v39, 0  ;;  %v695_v41 = vrot.slane %v693_v39, 1  ;;  %v696_v42 = vrot.slane %v693_v39, 2  ;;  %v697_v57 = vrot.slane %v693_v39, 3 }
 0x10b   : > { %v698_v60 = vrot.slane %v693_v39, 4  ;;  %v699_v7 = vrot.slane %v693_v39, 5  ;;  %v700_v17 = vrot.slane %v693_v39, 6  ;;  %v701_v19 = vrot.slane %v693_v39, 7  ;;  %v677_v39 = vld [vmem:[%s2173_s9] sm:$0xff] }
 0x10c   : > { %v718_v45 = vmul.f32 %v702_v40, %v645_v38  ;;  %v703_v46 = vperm.slane %v695_v41, 0  ;;  %v704_v47 = vperm.slane %v696_v42, 0  ;;  %v719_v56 = vmul.f32 %v702_v40, %v646_v48  ;;  %v679_v40 = vld [vmem:[%s2173_s9 + $0x10] sm:$0xff] }
 0x10d   : > { %v705_v62 = vperm.slane %v697_v57, 0  ;;  %v706_v2 = vperm.slane %v698_v60, 0  ;;  %v707_v12 = vperm.slane %v699_v7, 0  ;;  %v708_v22 = vperm.slane %v700_v17, 0  ;;  %v682_v60 = vld [vmem:[%s2173_s9 + $0x28] sm:$0xff] }
 0x10e   : > { %v735_v49 = vsel %vm734_vm4, %v718_v45, 0.0  ;;  %v720_v50 = vmul.f32 %v703_v46, %v647_v43  ;;  %v722_v51 = vmul.f32 %v704_v47, %v649_v44  ;;  %v723_v58 = vmul.f32 %v704_v47, %v650_v52  ;;  %v681_v43 = vld [vmem:[%s2173_s9 + $0x20] sm:$0xff]  ;;  %v678_v47 = vld [vmem:[%s2173_s9 + $0x8] sm:$0xff] }
 0x10f   : > { %736 = vadd.xlane.f32.xlu0 %v735_v49  ;;  %v721_v59 = vmul.f32 %v703_v46, %v648_v53  ;;  %v738_v61 = vsel %vm734_vm4, %v719_v56, 0.0  ;;  %v724_v5 = vmul.f32 %v705_v62, %v651_v63  ;;  %v726_v6 = vmul.f32 %v706_v2, %v653_v3  ;;  %v683_v53 = vld [vmem:[%s2173_s9 + $0x30] sm:$0xff]  ;;  %v688_v3 = vld [vmem:[%s2173_s9 + $0x58] sm:$0xff] }
 0x110   : > { %v741_v54 = vsel %vm734_vm4, %v720_v50, 0.0  ;;  %v747_v55 = vsel %vm734_vm4, %v722_v51, 0.0  ;;  %v750_v0 = vsel %vm734_vm4, %v723_v58, 0.0  ;;  %v725_v8 = vmul.f32 %v705_v62, %v652_v4  ;;  %v680_v51 = vld [vmem:[%s2173_s9 + $0x18] sm:$0xff]  ;;  %v685_v58 = vld [vmem:[%s2173_s9 + $0x40] sm:$0xff] }
 0x111   : > { %742 = vadd.xlane.f32.xlu1 %v741_v54  ;;  %748 = vadd.xlane.f32.xlu2 %v747_v55  ;;  %v744_v1 = vsel %vm734_vm4, %v721_v59, 0.0  ;;  %v753_v9 = vsel %vm734_vm4, %v724_v5, 0.0  ;;  %v759_v11 = vsel %vm734_vm4, %v726_v6, 0.0  ;;  %v727_v16 = vmul.f32 %v706_v2, %v654_v10  ;;  %v684_v4 = vld [vmem:[%s2173_s9 + $0x38] sm:$0xff]  ;;  %v689_v6 = vld [vmem:[%s2173_s9 + $0x60] sm:$0xff] }
 0x112   : > { %v756_v13 = vsel %vm734_vm4, %v725_v8, 0.0  ;;  %v729_v18 = vmul.f32 %v707_v12, %v656_v14  ;;  %v728_v20 = vmul.f32 %v707_v12, %v655_v15  ;;  %v709_v25 = vperm.slane %v701_v19, 0  ;;  %v687_v12 = vld [vmem:[%s2173_s9 + $0x50] sm:$0xff]  ;;  %v692_v14 = vld [vmem:[%s2173_s9 + $0x78] sm:$0xff] }
 0x113   : > { %v762_v21 = vsel %vm734_vm4, %v727_v16, 0.0  ;;  %v730_v29 = vmul.f32 %v708_v22, %v657_v23  ;;  %v731_v31 = vmul.f32 %v708_v22, %v658_v28  ;;  %v1926_v38 = vmov 0  }
 0x114   : > { %v768_v24 = vsel %vm734_vm4, %v729_v18, 0.0  ;;  %v765_v26 = vsel %vm734_vm4, %v728_v20, 0.0  ;;  %v732_v30 = vmul.f32 %v709_v25, %v659_v27  ;;  %v733_v36 = vmul.f32 %v709_v25, %v660_v33  ;;  %1681 = vset.pattern.permute.xlu1 %v1926_v38  ;;  %1683 = vset.pattern.permute.xlu0 %v1926_v38  ;;  %v690_v20 = vld [vmem:[%s2173_s9 + $0x68] sm:$0xff] }
 0x115   : > { %v771_v32 = vsel %vm734_vm4, %v730_v29, 0.0  ;;  %v774_v35 = vsel %vm734_vm4, %v731_v31, 0.0  ;;  %1682 = vset.pattern.permute.xlu2 %v1926_v38  ;;  %vm783_vm5 = vcmp.gt.f32.partialorder %v677_v39, 0.5  ;;  %vm785_vm6 = vcmp.gt.f32.partialorder %v679_v40, 0.5 }
 0x116   : > { %v777_v34 = vsel %vm734_vm4, %v732_v30, 0.0  ;;  %v780_v37 = vsel %vm734_vm4, %v733_v36, 0.0  ;;  %vm787_vm7 = vcmp.gt.f32.partialorder %v681_v43, 0.5  ;;  %vm784_vm8 = vcmp.gt.f32.partialorder %v678_v47, 0.5 }
 0x117   : > { %739 = vadd.xlane.f32.xlu0 %v738_v61  ;;  %vm786_vm9 = vcmp.gt.f32.partialorder %v680_v51, 0.5  ;;  %vm789_vm10 = vcmp.gt.f32.partialorder %v683_v53, 0.5  ;;  %v686_v61 = vld [vmem:[%s2173_s9 + $0x48] sm:$0xff]  ;;  %vm791_vm11 = vcmp.gt.f32.partialorder %v685_v58, 0.5  ;;  %vm788_vm12 = vcmp.gt.f32.partialorder %v682_v60, 0.5 }
 0x118   : > { %vm792_vm13 = vcmp.gt.f32.partialorder %v686_v61, 0.5  ;;  %vm794_vm14 = vcmp.gt.f32.partialorder %v688_v3, 0.5  ;;  %vm790_vm15 = vcmp.gt.f32.partialorder %v684_v4, 0.5  ;;  %vm795_vm0 = vcmp.gt.f32.partialorder %v689_v6, 0.5 }
 0x119   : > { %751 = vadd.xlane.f32.xlu2 %v750_v0  ;;  %745 = vadd.xlane.f32.xlu1 %v744_v1  ;;  %vm793_vm2 = vcmp.gt.f32.partialorder %v687_v12, 0.5  ;;  %vm798_vm3 = vcmp.gt.f32.partialorder %v692_v14, 0.5  ;;  %vm796_vm4 = vcmp.gt.f32.partialorder %v690_v20, 0.5  ;;  %v879_v31 = vlaneseq }
 0x11f   : > { %754 = vadd.xlane.f32.xlu0 %v753_v9 }
 0x121   : > { %760 = vadd.xlane.f32.xlu2 %v759_v11  ;;  %757 = vadd.xlane.f32.xlu1 %v756_v13  ;;  %v691_v11 = vld [vmem:[%s2173_s9 + $0x70] sm:$0xff] }
 0x122   : > { %vm797_vm1 = vcmp.gt.f32.partialorder %v691_v11, 0.5 }
 0x127   : > { %763 = vadd.xlane.f32.xlu0 %v762_v21 }
 0x129   : > { %769 = vadd.xlane.f32.xlu2 %v768_v24  ;;  %766 = vadd.xlane.f32.xlu1 %v765_v26 }
 0x12f   : > { %772 = vadd.xlane.f32.xlu0 %v771_v32 }
 0x131   : > { %778 = vadd.xlane.f32.xlu2 %v777_v34  ;;  %775 = vadd.xlane.f32.xlu1 %v774_v35  ;;  %v2290_v34 = vand.u32 127, %v879_v31 }
 0x133   : > { %v2293_v36 = vadd.s32 4294967288, %v2290_v34 }
 0x137   : > { %781 = vadd.xlane.f32.xlu0 %v780_v37 }
 0x182   : > { %v737_v41 = vpop.xlane.xlu0 %736 }
 0x183   : > { %v2228_v42 = vsel %vm783_vm5, -8.999999e+09, %v737_v41  ;;  %vm884_vm5 = vcmask 130112  }
 0x184   : > { %v743_v44 = vpop.xlane.xlu1 %742  ;;  %832 = vperm.xlu1 %1681, %v2228_v42   ;;  %v749_v45 = vpop.xlane.xlu2 %748 }
 0x185   : > { %v2232_v46 = vsel %vm785_vm6, -8.999999e+09, %v743_v44  ;;  %v2236_v48 = vsel %vm787_vm7, -8.999999e+09, %v749_v45  ;;  %vm907_vm6 = vcmask 1041409   ;;  %vm909_vm7 = vcmask 1042434  }
 0x186   : > { %838 = vperm.xlu0 %1683, %v2232_v46  }
 0x18a   : > { %v740_v49 = vpop.xlane.xlu0 %739 }
 0x18b   : > { %v2238_v50 = vsel %vm784_vm8, -8.999999e+09, %v740_v49  ;;  %vm911_vm8 = vcmask 1043459  }
 0x18c   : > { %844 = vperm.xlu1 %1681, %v2236_v48   ;;  %835 = vperm.xlu2 %1682, %v2238_v50   ;;  %v752_v52 = vpop.xlane.xlu2 %751  ;;  %v746_v54 = vpop.xlane.xlu1 %745 }
 0x18d   : > { %v2244_v55 = vsel %vm786_vm9, -8.999999e+09, %v746_v54  ;;  %v2255_v1 = vsel %vm788_vm12, -8.999999e+09, %v752_v52  ;;  %vm913_vm9 = vcmask 1044484   ;;  %vm919_vm12 = vcmask 1047559  }
 0x192   : > { %v755_v56 = vpop.xlane.xlu0 %754 }
 0x193   : > { %v2246_v57 = vsel %vm789_vm10, -8.999999e+09, %v755_v56  ;;  %vm915_vm10 = vcmask 1045509  }
 0x194   : > { %841 = vperm.xlu2 %1682, %v2244_v55   ;;  %850 = vperm.xlu1 %1681, %v2246_v57   ;;  %v761_v59 = vpop.xlane.xlu2 %760  ;;  %v758_v0 = vpop.xlane.xlu1 %757 }
 0x195   : > { %v2253_v62 = vsel %vm791_vm11, -8.999999e+09, %v761_v59  ;;  %v2267_v8 = vsel %vm790_vm15, -8.999999e+09, %v758_v0  ;;  %vm917_vm11 = vcmask 1046534   ;;  %vm1138_vm15 = vcmask 523264  }
 0x19a   : > { %v764_v63 = vpop.xlane.xlu0 %763 }
 0x19b   : > { %v2257_v2 = vsel %vm792_vm13, -8.999999e+09, %v764_v63  ;;  %vm924_vm13 = vcmask 130048  }
 0x19c   : > { %847 = vperm.xlu2 %1682, %v2255_v1   ;;  %856 = vperm.xlu1 %1681, %v2253_v62   ;;  %v770_v5 = vpop.xlane.xlu2 %769  ;;  %v767_v13 = vpop.xlane.xlu1 %766 }
 0x19d   : > { %859 = vperm.xlu0 %1683, %v2257_v2   ;;  %v2265_v7 = vsel %vm794_vm14, -8.999999e+09, %v770_v5  ;;  %v2279_v17 = vsel %vm793_vm2, -8.999999e+09, %v767_v13  ;;  %vm1104_vm14 = vcmask 7168  }
 0x1a2   : > { %v773_v9 = vpop.xlane.xlu0 %772 }
 0x1a3   : > { %v2269_v10 = vsel %vm795_vm0, -8.999999e+09, %v773_v9 }
 0x1a4   : > { %853 = vperm.xlu2 %1682, %v2267_v8   ;;  %865 = vperm.xlu1 %1681, %v2265_v7   ;;  %v779_v15 = vpop.xlane.xlu2 %778  ;;  %v776_v21 = vpop.xlane.xlu1 %775 }
 0x1a5   : > { %868 = vperm.xlu0 %1683, %v2269_v10   ;;  %v2277_v16 = vsel %vm797_vm1, -8.999999e+09, %v779_v15  ;;  %v2287_v22 = vsel %vm796_vm4, -8.999999e+09, %v776_v21 }
 0x1aa   : > { %v782_v18 = vpop.xlane.xlu0 %781 }
 0x1ab   : > { %v2281_v19 = vsel %vm798_vm3, -8.999999e+09, %v782_v18 }
 0x1ac   : > { %862 = vperm.xlu2 %1682, %v2279_v17   ;;  %874 = vperm.xlu1 %1681, %v2277_v16  }
 0x1ad   : > { %877 = vperm.xlu0 %1683, %v2281_v19  }
 0x1b4   : > { %871 = vperm.xlu2 %1682, %v2287_v22  }
 0x1e6   : > { %v836_v23 = vpop.permute.xlu2 %835 }
 0x1e7   : > { %v883_v51 = vperm.slane %v836_v23, %v2293_v36 }
 0x1ee   : > { %v842_v24 = vpop.permute.xlu2 %841 }
 0x1ef   : > { %v887_v39 = vperm.slane %v842_v24, %v2293_v36 }
 0x1f6   : > { %v833_v25 = vpop.permute.xlu1 %832  ;;  %v848_v26 = vpop.permute.xlu2 %847 }
 0x1f7   : > { %v881_v40 = vperm.slane %v833_v25, %v2290_v34  ;;  %v890_v44 = vperm.slane %v848_v26, %v2293_v36  ;;  %v2329_v26 = vld [vmem:[#allocation3] sm:$0xff] }
 0x1f8   : > { %v839_v30 = vpop.permute.xlu0 %838 }
 0x1f9   : > { %v886_v37 = vperm.slane %v839_v30, %v2290_v34  ;;  %v885_v58 = vsel %vm884_vm5, %v883_v51, %v881_v40 }
 0x1fb   : > { %v888_v52 = vsel %vm884_vm5, %v887_v39, %v886_v37 }
 0x1fc   : > { %v908_v63 = vsel %vm907_vm6, %v888_v52, %v885_v58 }
 0x1fe   : > { %v845_v27 = vpop.permute.xlu1 %844  ;;  %v854_v28 = vpop.permute.xlu2 %853 }
 0x1ff   : > { %v889_v38 = vperm.slane %v845_v27, %v2290_v34  ;;  %v893_v53 = vperm.slane %v854_v28, %v2293_v36 }
 0x201   : > { %v891_v56 = vsel %vm884_vm5, %v890_v44, %v889_v38 }
 0x202   : > { %v910_v4 = vsel %vm909_vm7, %v891_v56, %v908_v63 }
 0x206   : > { %v851_v29 = vpop.permute.xlu1 %850  ;;  %v863_v35 = vpop.permute.xlu2 %862 }
 0x207   : > { %v892_v41 = vperm.slane %v851_v29, %v2290_v34  ;;  %v898_v59 = vperm.slane %v863_v35, %v2290_v34 }
 0x209   : > { %v894_v60 = vsel %vm884_vm5, %v893_v53, %v892_v41 }
 0x20a   : > { %v912_v6 = vsel %vm911_vm8, %v894_v60, %v910_v4 }
 0x20e   : > { %v857_v32 = vpop.permute.xlu1 %856  ;;  %v872_v61 = vpop.permute.xlu2 %871 }
 0x20f   : > { %v860_v33 = vpop.permute.xlu0 %859  ;;  %v895_v45 = vperm.slane %v857_v32, %v2290_v34  ;;  %v902_v9 = vperm.slane %v872_v61, %v2293_v36 }
 0x210   : > { %v896_v47 = vperm.slane %v860_v33, %v2293_v36 }
 0x212   : > { %v897_v0 = vsel %vm884_vm5, %v896_v47, %v895_v45 }
 0x213   : > { %v914_v11 = vsel %vm913_vm9, %v897_v0, %v912_v6 }
 0x216   : > { %v866_v43 = vpop.permute.xlu1 %865 }
 0x217   : > { %v869_v49 = vpop.permute.xlu0 %868  ;;  %v899_v54 = vperm.slane %v866_v43, %v2293_v36 }
 0x218   : > { %v901_v3 = vperm.slane %v869_v49, %v2290_v34 }
 0x219   : > { %v900_v5 = vsel %vm884_vm5, %v899_v54, %v898_v59 }
 0x21a   : > { %v903_v13 = vsel %vm884_vm5, %v902_v9, %v901_v3  ;;  %v916_v18 = vsel %vm915_vm10, %v900_v5, %v914_v11 }
 0x21b   : > { %v918_v23 = vsel %vm917_vm11, %v903_v13, %v916_v18 }
 0x21e   : > { %v875_v12 = vpop.permute.xlu1 %874 }
 0x21f   : > { %v904_v14 = vperm.slane %v875_v12, %v2290_v34  ;;  %v878_v15 = vpop.permute.xlu0 %877 }
 0x220   : > { %v905_v20 = vperm.slane %v878_v15, %v2293_v36 }
 0x222   : > { %v906_v21 = vsel %vm884_vm5, %v905_v20, %v904_v14 }
 0x223   : > { %v920_v24 = vsel %vm919_vm12, %v906_v21, %v918_v23 }
 0x224   : > { %v927_v25 = vsel %vm924_vm13, %v920_v24, -inf  ;;  %925 = vst.msk [vmem:[%s923_s24] sm:$0xff] %vm924_vm13, %v920_v24 }
 0x225   : > { %928 = vmax.xlane.f32.xlu2 %v927_v25 }
 0x298   : > { %v929_v27 = vpop.xlane.xlu2 %928 }
 0x299   : > { %v2332_v28 = vmax.f32 %v2329_v26, %v929_v27 }
 0x29b   : > { %v931_v29 = vsub.f32 %v2329_v26, %v2332_v28  ;;  %1236 = vst.msk [vmem:[#allocation3] sm:$0xff] %vm1104_vm14, %v2332_v28  ;;  %936 = vperm.xlu1 %1681, %v2332_v28  }
 0x29d   : > { %v932_v24 = vmul.f32 1.442695, %v931_v29 }
 0x30d   : > { %v2339_v30 = vpop.permute.xlu1 %936 }
 0x30e   : > { %v943_v31 = vperm.slane %v2339_v30, 5  ;;  %v938_v32 = vperm.slane %v2339_v30, 0  ;;  %v939_v38 = vperm.slane %v2339_v30, 1  ;;  %v940_v47 = vperm.slane %v2339_v30, 2 }
 0x30f   : > { %v941_v53 = vperm.slane %v2339_v30, 3 }
 0x310   : > { %v964_v33 = vsub.f32 %v2279_v17, %v943_v31  ;;  %v955_v35 = vsub.f32 %v2238_v50, %v938_v32  ;;  %v954_v37 = vsub.f32 %v2228_v42, %v938_v32  ;;  %v957_v43 = vsub.f32 %v2244_v55, %v939_v38 }
 0x311   : > { %v956_v44 = vsub.f32 %v2232_v46, %v939_v38  ;;  %v959_v51 = vsub.f32 %v2255_v1, %v940_v47  ;;  %v958_v52 = vsub.f32 %v2236_v48, %v940_v47  ;;  %v961_v58 = vsub.f32 %v2267_v8, %v941_v53  ;;  %v666_v47 = vld [vmem:[%s2167_s21 + $0x28] sm:$0xff] }
 0x312   : > { %v990_v39 = vmul.f32 1.442695, %v964_v33  ;;  %v972_v40 = vmul.f32 1.442695, %v955_v35  ;;  %v970_v41 = vmul.f32 1.442695, %v954_v37  ;;  %v960_v59 = vsub.f32 %v2246_v57, %v941_v53 }
 0x313   : > { %v976_v45 = vmul.f32 1.442695, %v957_v43  ;;  %v974_v49 = vmul.f32 1.442695, %v956_v44  ;;  %v980_v55 = vmul.f32 1.442695, %v959_v51  ;;  %v965_v11 = vsub.f32 %v2265_v7, %v943_v31 }
 0x314   : > { %1684 = vpow2.f32 %v990_v39  ;;  %v978_v46 = vmul.f32 1.442695, %v958_v52  ;;  %v984_v60 = vmul.f32 1.442695, %v961_v58  ;;  %v942_v1 = vperm.slane %v2339_v30, 4  ;;  %v662_v35 = vld [vmem:[%s2167_s21 + $0x8] sm:$0xff] }
 0x315   : > { %1686 = vpow2.f32 %v972_v40  ;;  %v982_v61 = vmul.f32 1.442695, %v960_v59  ;;  %v944_v8 = vperm.slane %v2339_v30, 6  ;;  %v992_v13 = vmul.f32 1.442695, %v965_v11  ;;  %v661_v37 = vld [vmem:[%s2167_s21] sm:$0xff] }
 0x316   : > { %1688 = vpow2.f32 %v970_v41  ;;  %v963_v0 = vsub.f32 %v2257_v2, %v942_v1  ;;  %v962_v3 = vsub.f32 %v2253_v62, %v942_v1  ;;  %v945_v2 = vperm.slane %v2339_v30, 7  ;;  %v664_v39 = vld [vmem:[%s2167_s21 + $0x18] sm:$0xff]  ;;  %v663_v40 = vld [vmem:[%s2167_s21 + $0x10] sm:$0xff]  ;;  %v670_v53 = vld [vmem:[%s2167_s21 + $0x48] sm:$0xff] }
 0x317   : > { %1690 = vpow2.f32 %v976_v45  ;;  %v966_v9 = vsub.f32 %v2269_v10, %v944_v8  ;;  %v967_v18 = vsub.f32 %v2287_v22, %v944_v8  ;;  %v667_v51 = vld [vmem:[%s2167_s21 + $0x30] sm:$0xff] }
 0x318   : > { %1692 = vpow2.f32 %v974_v49  ;;  %v988_v4 = vmul.f32 1.442695, %v963_v0  ;;  %v986_v5 = vmul.f32 1.442695, %v962_v3  ;;  %v968_v15 = vsub.f32 %v2277_v16, %v945_v2 }
 0x319   : > { %1694 = vpow2.f32 %v980_v55  ;;  %v994_v12 = vmul.f32 1.442695, %v966_v9  ;;  %v996_v21 = vmul.f32 1.442695, %v967_v18  ;;  %v969_v7 = vsub.f32 %v2281_v19, %v945_v2 }
 0x31a   : > { %v1685_v17 = vpop.eup %1684  ;;  %1696 = vpow2.f32 %v978_v46  ;;  %v998_v20 = vmul.f32 1.442695, %v968_v15 }
 0x31b   : > { %v1687_v50 = vpop.eup %1686  ;;  %1051 = vperm.xlu2 %1682, %v1685_v17   ;;  %1698 = vpow2.f32 %v984_v60  ;;  %v1000_v25 = vmul.f32 1.442695, %v969_v7  ;;  %v665_v17 = vld [vmem:[%s2167_s21 + $0x20] sm:$0xff]  ;;  %v671_v60 = vld [vmem:[%s2167_s21 + $0x50] sm:$0xff] }
 0x31c   : > { %v1689_v42 = vpop.eup %1688  ;;  %1024 = vperm.xlu1 %1681, %v1687_v50   ;;  %1700 = vpow2.f32 %v982_v61 }
 0x31d   : > { %1021 = vperm.xlu0 %1683, %v1689_v42   ;;  %v1691_v54 = vpop.eup %1690  ;;  %1702 = vpow2.f32 %v988_v4  ;;  %v668_v42 = vld [vmem:[%s2167_s21 + $0x38] sm:$0xff] }
 0x31e   : > { %v1693_v56 = vpop.eup %1692  ;;  %1704 = vpow2.f32 %v986_v5 }
 0x31f   : > { %v1695_v63 = vpop.eup %1694  ;;  %1706 = vpow2.f32 %v994_v12  ;;  %v672_v12 = vld [vmem:[%s2167_s21 + $0x58] sm:$0xff] }
 0x320   : > { %v1697_v48 = vpop.eup %1696  ;;  %1708 = vpow2.f32 %v992_v13 }
 0x321   : > { %v1699_v6 = vpop.eup %1698  ;;  %1710 = vpow2.f32 %v998_v20 }
 0x322   : > { %v1701_v57 = vpop.eup %1700  ;;  %1712 = vpow2.f32 %v996_v21 }
 0x323   : > { %v1703_v14 = vpop.eup %1702  ;;  %1714 = vpow2.f32 %v932_v24 }
 0x324   : > { %1030 = vperm.xlu1 %1681, %v1691_v54   ;;  %v1705_v62 = vpop.eup %1704  ;;  %1716 = vpow2.f32 %v1000_v25  ;;  %v669_v54 = vld [vmem:[%s2167_s21 + $0x40] sm:$0xff] }
 0x325   : > { %1027 = vperm.xlu0 %1683, %v1693_v56   ;;  %v1707_v10 = vpop.eup %1706 }
 0x326   : > { %v1709_v23 = vpop.eup %1708 }
 0x327   : > { %v1711_v27 = vpop.eup %1710 }
 0x328   : > { %v1713_v16 = vpop.eup %1712 }
 0x329   : > { %v2368_v22 = vpop.eup %1714 }
 0x32a   : > { %v1717_v30 = vpop.eup %1716 }
 0x32c   : > { %1036 = vperm.xlu1 %1681, %v1695_v63  }
 0x32d   : > { %1033 = vperm.xlu0 %1683, %v1697_v48  }
 0x334   : > { %1042 = vperm.xlu1 %1681, %v1699_v6  }
 0x335   : > { %1039 = vperm.xlu0 %1683, %v1701_v57  }
 0x33c   : > { %1048 = vperm.xlu1 %1681, %v1703_v14  }
 0x33d   : > { %1045 = vperm.xlu0 %1683, %v1705_v62  }
 0x344   : > { %1057 = vperm.xlu1 %1681, %v1707_v10  }
 0x345   : > { %1054 = vperm.xlu0 %1683, %v1709_v23  }
 0x34c   : > { %1063 = vperm.xlu1 %1681, %v1711_v27  }
 0x34d   : > { %1060 = vperm.xlu0 %1683, %v1713_v16  }
 0x354   : > { %1214 = vperm.xlu1 %1681, %v2368_v22  }
 0x355   : > { %1066 = vperm.xlu0 %1683, %v1717_v30  }
 0x375   : > { %v2412_v1 = vpop.permute.xlu2 %1051 }
 0x376   : > { %v1132_v6 = vmul.f32 %v2412_v1, %v671_v60 }
 0x378   : > { %v1184_v18 = vsel %vm1138_vm15, %v1132_v6, 0.0 }
 0x38e   : > { %v2371_v19 = vpop.permute.xlu1 %1024 }
 0x38f   : > { %v2373_v26 = vpop.permute.xlu0 %1021  ;;  %v1123_v41 = vmul.f32 %v2371_v19, %v662_v35  ;;  %v1069_v10 = vperm.slane %v2371_v19, %v2293_v36 }
 0x390   : > { %v1122_v43 = vmul.f32 %v2373_v26, %v661_v37  ;;  %v1068_v23 = vperm.slane %v2373_v26, %v2290_v34 }
 0x391   : > { %v1140_v49 = vsel %vm1138_vm15, %v1123_v41, 0.0  ;;  %v1083_v41 = vperm.slane %v2412_v1, %v2290_v34 }
 0x392   : > { %v1139_v50 = vsel %vm1138_vm15, %v1122_v43, 0.0 }
 0x393   : > { %v1141_v61 = vadd.f32 %v1140_v49, %v1139_v50 }
 0x395   : > { %v1142_v57 = vrot.slane %v1141_v61, 4 }
 0x396   : > { %v2375_v28 = vpop.permute.xlu1 %1030 }
 0x397   : > { %v2377_v29 = vpop.permute.xlu0 %1027  ;;  %v1125_v44 = vmul.f32 %v2375_v28, %v664_v39  ;;  %v1143_v7 = vadd.f32 %v1142_v57, %v1141_v61  ;;  %v1072_v27 = vperm.slane %v2375_v28, %v2293_v36  ;;  %v673_v39 = vld [vmem:[%s2167_s21 + $0x60] sm:$0xff] }
 0x398   : > { %v1124_v45 = vmul.f32 %v2377_v29, %v663_v40  ;;  %v1071_v16 = vperm.slane %v2377_v29, %v2290_v34 }
 0x399   : > { %v1149_v58 = vsel %vm1138_vm15, %v1125_v44, 0.0  ;;  %v1144_v26 = vrot.slane %v1143_v7, 2  ;;  %v674_v44 = vld [vmem:[%s2167_s21 + $0x68] sm:$0xff] }
 0x39a   : > { %v1148_v59 = vsel %vm1138_vm15, %v1124_v45, 0.0  ;;  %v1070_v45 = vsel %vm884_vm5, %v1069_v10, %v1068_v23  ;;  %v1073_v28 = vsel %vm884_vm5, %v1072_v27, %v1071_v16 }
 0x39b   : > { %v1150_v4 = vadd.f32 %v1149_v58, %v1148_v59  ;;  %v1145_v58 = vadd.f32 %v1144_v26, %v1143_v7 }
 0x39d   : > { %v1151_v62 = vrot.slane %v1150_v4, 4 }
 0x39e   : > { %v2379_v31 = vpop.permute.xlu1 %1036 }
 0x39f   : > { %v2381_v32 = vpop.permute.xlu0 %1033  ;;  %v1127_v52 = vmul.f32 %v2379_v31, %v666_v47  ;;  %v1152_v37 = vadd.f32 %v1151_v62, %v1150_v4  ;;  %v1075_v49 = vperm.slane %v2379_v31, %v2293_v36  ;;  %v1092_v4 = vsel %vm907_vm6, %v1073_v28, %v1070_v45 }
 0x3a0   : > { %v1126_v55 = vmul.f32 %v2381_v32, %v665_v17  ;;  %v1074_v50 = vperm.slane %v2381_v32, %v2290_v34  ;;  %v1146_v28 = vrot.slane %v1145_v58, 1 }
 0x3a1   : > { %v1158_v8 = vsel %vm1138_vm15, %v1127_v52, 0.0  ;;  %v1153_v29 = vrot.slane %v1152_v37, 2 }
 0x3a2   : > { %v1157_v5 = vsel %vm1138_vm15, %v1126_v55, 0.0 }
 0x3a3   : > { %v1159_v2 = vadd.f32 %v1158_v8, %v1157_v5 }
 0x3a5   : > { %v1160_v30 = vrot.slane %v1159_v2, 4 }
 0x3a6   : > { %v2383_v33 = vpop.permute.xlu1 %1042 }
 0x3a7   : > { %v2387_v38 = vpop.permute.xlu0 %1039  ;;  %v1129_v63 = vmul.f32 %v2383_v33, %v668_v42  ;;  %v1161_v47 = vadd.f32 %v1160_v30, %v1159_v2  ;;  %v1078_v52 = vperm.slane %v2383_v33, %v2293_v36 }
 0x3a8   : > { %v1128_v48 = vmul.f32 %v2387_v38, %v667_v51  ;;  %v1077_v55 = vperm.slane %v2387_v38, %v2290_v34  ;;  %v1076_v38 = vsel %vm884_vm5, %v1075_v49, %v1074_v50 }
 0x3a9   : > { %v1167_v9 = vsel %vm1138_vm15, %v1129_v63, 0.0  ;;  %v1162_v32 = vrot.slane %v1161_v47, 2  ;;  %v1093_v2 = vsel %vm909_vm7, %v1076_v38, %v1092_v4  ;;  %v1211_v38 = vld [vmem:[#allocation5] sm:$0xff] }
 0x3aa   : > { %v1166_v11 = vsel %vm1138_vm15, %v1128_v48, 0.0  ;;  %v675_v48 = vld [vmem:[%s2167_s21 + $0x70] sm:$0xff]  ;;  %v1079_v8 = vsel %vm884_vm5, %v1078_v52, %v1077_v55  ;;  %v1147_v55 = vadd.f32 %v1146_v28, %v1145_v58 }
 0x3ab   : > { %v1168_v20 = vadd.f32 %v1167_v9, %v1166_v11 }
 0x3ad   : > { %v1169_v19 = vrot.slane %v1168_v20, 4 }
 0x3ae   : > { %v2404_v46 = vpop.permute.xlu1 %1048 }
 0x3af   : > { %v2407_v56 = vpop.permute.xlu0 %1045  ;;  %v1131_v0 = vmul.f32 %v2404_v46, %v670_v53  ;;  %v1170_v53 = vadd.f32 %v1169_v19, %v1168_v20  ;;  %v1081_v59 = vperm.slane %v2404_v46, %v2293_v36 }
 0x3b0   : > { %v1130_v3 = vmul.f32 %v2407_v56, %v669_v54  ;;  %v1080_v31 = vperm.slane %v2407_v56, %v2290_v34  ;;  %v1154_v56 = vadd.f32 %v1153_v29, %v1152_v37 }
 0x3b1   : > { %v1176_v13 = vsel %vm1138_vm15, %v1131_v0, 0.0  ;;  %v1171_v5 = vrot.slane %v1170_v53, 2 }
 0x3b2   : > { %v1175_v14 = vsel %vm1138_vm15, %v1130_v3, 0.0  ;;  %v1082_v6 = vsel %vm884_vm5, %v1081_v59, %v1080_v31 }
 0x3b3   : > { %v1177_v24 = vadd.f32 %v1176_v13, %v1175_v14  ;;  %v1163_v13 = vadd.f32 %v1162_v32, %v1161_v47  ;;  %v1172_v27 = vadd.f32 %v1171_v5, %v1170_v53  ;;  %v1002_v5 = vld [vmem:[#allocation4] sm:$0xff] }
 0x3b5   : > { %v1178_v43 = vrot.slane %v1177_v24, 4  ;;  %v1173_v47 = vrot.slane %v1172_v27, 1 }
 0x3b6   : > { %v1058_v25 = vpop.permute.xlu1 %1057 }
 0x3b7   : > { %v1055_v15 = vpop.permute.xlu0 %1054  ;;  %v1134_v17 = vmul.f32 %v1058_v25, %v673_v39  ;;  %v1179_v60 = vadd.f32 %v1178_v43, %v1177_v24  ;;  %v1086_v9 = vperm.slane %v1058_v25, %v2290_v34  ;;  %v1164_v43 = vrot.slane %v1163_v13, 1 }
 0x3b8   : > { %v1133_v21 = vmul.f32 %v1055_v15, %v672_v12  ;;  %v1084_v61 = vperm.slane %v1055_v15, %v2293_v36  ;;  %v676_v12 = vld [vmem:[%s2167_s21 + $0x78] sm:$0xff]  ;;  %v1094_v15 = vsel %vm911_vm8, %v1079_v8, %v1093_v2  ;;  %v1174_v53 = vadd.f32 %v1173_v47, %v1172_v27 }
 0x3b9   : > { %v1193_v1 = vsel %vm1138_vm15, %v1134_v17, 0.0  ;;  %v1180_v57 = vrot.slane %v1179_v60, 2  ;;  %v1095_v25 = vsel %vm913_vm9, %v1082_v6, %v1094_v15  ;;  %v1003_v6 = vmul.f32 %v2368_v22, %v1002_v5 }
 0x3ba   : > { %v1185_v35 = vsel %vm1138_vm15, %v1133_v21, 0.0  ;;  %v1085_v14 = vsel %vm884_vm5, %v1084_v61, %v1083_v41  ;;  %v1155_v41 = vrot.slane %v1154_v56, 1 }
 0x3bb   : > { %v1186_v40 = vadd.f32 %v1185_v35, %v1184_v18  ;;  %v1181_v16 = vadd.f32 %v1180_v57, %v1179_v60  ;;  %v1096_v35 = vsel %vm915_vm10, %v1085_v14, %v1095_v25 }
 0x3bc   : > { %v1156_v49 = vadd.f32 %v1155_v41, %v1154_v56 }
 0x3bd   : > { %v1187_v42 = vrot.slane %v1186_v40, 4  ;;  %v1182_v29 = vrot.slane %v1181_v16, 1 }
 0x3be   : > { %v1064_v0 = vpop.permute.xlu1 %1063  ;;  %v1226_v31 = vsel %vm907_vm6, %v1156_v49, %v1147_v55 }
 0x3bf   : > { %v1061_v51 = vpop.permute.xlu0 %1060  ;;  %v1188_v63 = vadd.f32 %v1187_v42, %v1186_v40  ;;  %v1136_v62 = vmul.f32 %v1064_v0, %v675_v48  ;;  %v1089_v23 = vperm.slane %v1064_v0, %v2290_v34  ;;  %v1183_v59 = vadd.f32 %v1182_v29, %v1181_v16 }
 0x3c0   : > { %v1135_v54 = vmul.f32 %v1061_v51, %v674_v44  ;;  %v1087_v3 = vperm.slane %v1061_v51, %v2293_v36  ;;  %v1165_v51 = vadd.f32 %v1164_v43, %v1163_v13 }
 0x3c1   : > { %v1189_v18 = vrot.slane %v1188_v63, 2  ;;  %v1202_v37 = vsel %vm1138_vm15, %v1136_v62, 0.0 }
 0x3c2   : > { %v1194_v33 = vsel %vm1138_vm15, %v1135_v54, 0.0  ;;  %v1088_v10 = vsel %vm884_vm5, %v1087_v3, %v1086_v9  ;;  %v1227_v61 = vsel %vm909_vm7, %v1165_v51, %v1226_v31 }
 0x3c3   : > { %v1195_v46 = vadd.f32 %v1194_v33, %v1193_v1  ;;  %v1097_v19 = vsel %vm917_vm11, %v1088_v10, %v1096_v35  ;;  %v1190_v34 = vadd.f32 %v1189_v18, %v1188_v63  ;;  %v1228_v63 = vsel %vm911_vm8, %v1174_v53, %v1227_v61 }
 0x3c4   : > { %v1229_v0 = vsel %vm913_vm9, %v1183_v59, %v1228_v63 }
 0x3c5   : > { %v1196_v11 = vrot.slane %v1195_v46, 4  ;;  %v1191_v50 = vrot.slane %v1190_v34, 1 }
 0x3c6   : > { %v1215_v48 = vpop.permute.xlu1 %1214 }
 0x3c7   : > { %v1197_v20 = vadd.f32 %v1196_v11, %v1195_v46  ;;  %v1067_v21 = vpop.permute.xlu0 %1066  ;;  %v1192_v60 = vadd.f32 %v1191_v50, %v1190_v34  ;;  %v1217_v4 = vmul.f32 %v1215_v48, %v1211_v38 }
 0x3c8   : > { %v1090_v7 = vperm.slane %v1067_v21, %v2293_v36  ;;  %v1137_v24 = vmul.f32 %v1067_v21, %v676_v12 }
 0x3c9   : > { %v1198_v30 = vrot.slane %v1197_v20, 2  ;;  %v1230_v58 = vsel %vm915_vm10, %v1192_v60, %v1229_v0 }
 0x3ca   : > { %v1203_v39 = vsel %vm1138_vm15, %v1137_v24, 0.0  ;;  %v1091_v40 = vsel %vm884_vm5, %v1090_v7, %v1089_v23 }
 0x3cb   : > { %v1204_v26 = vadd.f32 %v1203_v39, %v1202_v37  ;;  %v1098_v36 = vsel %vm919_vm12, %v1091_v40, %v1097_v19  ;;  %v1199_v44 = vadd.f32 %v1198_v30, %v1197_v20 }
 0x3cc   : > { %v1100_v45 = vsel %vm924_vm13, %v1098_v36, 0.0 }
 0x3cd   : > { %v1205_v17 = vrot.slane %v1204_v26, 4  ;;  %1101 = vadd.xlane.f32.xlu2 %v1100_v45  ;;  %v1200_v52 = vrot.slane %v1199_v44, 1 }
 0x3cf   : > { %v1206_v42 = vadd.f32 %v1205_v17, %v1204_v26  ;;  %v1201_v1 = vadd.f32 %v1200_v52, %v1199_v44 }
 0x3d1   : > { %v1207_v54 = vrot.slane %v1206_v42, 2  ;;  %v1231_v46 = vsel %vm917_vm11, %v1201_v1, %v1230_v58 }
 0x3d3   : > { %v1208_v32 = vadd.f32 %v1207_v54, %v1206_v42 }
 0x3d5   : > { %v1209_v33 = vrot.slane %v1208_v32, 1 }
 0x3d7   : > { %v1210_v3 = vadd.f32 %v1209_v33, %v1208_v32 }
 0x3d9   : > { %v1232_v56 = vsel %vm919_vm12, %v1210_v3, %v1231_v46 }
 0x3da   : > { %v1234_v8 = vadd.f32 %v1232_v56, %v1217_v4 }
 0x3dc   : > { %1235 = vst.msk [vmem:[#allocation5] sm:$0xff] %vm1138_vm15, %v1234_v8 }
 0x43f   : > { %1240 = sbr.rel (%p1536_p7) target bundleno = 1236 (0x4d4), region = 132 }
 0x440   : > { %v1102_v57 = vpop.xlane.xlu2 %1101 }
 0x441   : > { %v1103_v9 = vadd.f32 %v1102_v57, %v1003_v6 }
 0x443   : > { %1105 = vst.msk [vmem:[#allocation4] sm:$0xff] %vm1104_vm14, %v1103_v9 }
 0x444   : > { %v1265_v11 = vld [vmem:[#allocation3] sm:$0xff]  ;;  %v1927_v2 = vmov 0   ;;  %v1266_v7 = vld [vmem:[#allocation6] sm:$0xff]  ;;  %v1257_v40 = vld [vmem:[#allocation5] sm:$0xff] }
 0x445   : > { %1718 = vset.pattern.permute.xlu0 %v1927_v2  ;;  %v1267_v24 = vld [vmem:[#allocation6 + $0x8] sm:$0xff] }
 0x446   : > { %1270 = vperm.xlu0 %1718, %v1265_v11  }
 0x44a   : > { %v1241_v12 = vld [vmem:[#allocation4] sm:$0xff] }
 0x44b   : > { %1719 = vrcp.f32 %v1241_v12  ;;  %v1253_v62 = vand.u32 2147483648, %v1241_v12  ;;  %vm1247_vm0 = vweird.f32 %v1241_v12  ;;  %v1251_v22 = vand.u32 2147483647, %v1241_v12 }
 0x44d   : > { %v1254_v20 = vor.u32 1.1754944e-38, %v1253_v62  ;;  %vm1252_vm3 = vcmp.eq.f32.partialorder %v1251_v22, 8.507059e+37 }
 0x451   : > { %v1720_v13 = vpop.eup %1719 }
 0x452   : > { %v1243_v14 = vmul.f32 %v1720_v13, %v1241_v12  ;;  %vm1248_vm1 = vweird.f32 %v1720_v13 }
 0x453   : > { %vm1249_vm2 = vmor %vm1247_vm0, %vm1248_vm1 }
 0x454   : > { %v1244_v15 = vsub.f32 1.0, %v1243_v14 }
 0x456   : > { %v1245_v18 = vmul.f32 %v1720_v13, %v1244_v15 }
 0x458   : > { %v1246_v21 = vadd.f32 %v1720_v13, %v1245_v18 }
 0x45a   : > { %v1250_v10 = vsel %vm1249_vm2, %v1720_v13, %v1246_v21 }
 0x45b   : > { %v1255_v23 = vsel %vm1252_vm3, %v1254_v20, %v1250_v10 }
 0x45c   : > { %1260 = vperm.xlu0 %1718, %v1255_v23  }
 0x4b8   : > { %v1271_v25 = vpop.permute.xlu0 %1270 }
 0x4b9   : > { %v1273_v27 = vsub.f32 %v1266_v7, %v1271_v25  ;;  %v1274_v16 = vsub.f32 %v1267_v24, %v1271_v25 }
 0x4bb   : > { %v1275_v30 = vmul.f32 1.442695, %v1273_v27  ;;  %v1277_v35 = vmul.f32 1.442695, %v1274_v16 }
 0x4bd   : > { %1721 = vpow2.f32 %v1275_v30 }
 0x4be   : > { %1723 = vpow2.f32 %v1277_v35 }
 0x4c3   : > { %v1722_v37 = vpop.eup %1721 }
 0x4c4   : > { %v1724_v39 = vpop.eup %1723 }
 0x4ce   : > { %v1261_v19 = vpop.permute.xlu0 %1260 }
 0x4cf   : > { %v1263_v41 = vmul.f32 %v1261_v19, %v1257_v40  ;;  %v1279_v34 = vmul.f32 %v1722_v37, %v1261_v19  ;;  %v1280_v26 = vmul.f32 %v1724_v39, %v1261_v19 }
 0x4d1   : > { %1264 = vst.msk [vmem:[%s2189_s18] sm:$0xff] %vm1138_vm15, %v1263_v41 }
 0x4d2   : > { %1281 = vst.msk [vmem:[%s2191_s15] sm:$0xff] %vm924_vm13, %v1279_v34 }
 0x4d3   : > { %1282 = vst.msk [vmem:[%s2191_s15 + $0x8] sm:$0xff] %vm924_vm13, %v1280_v26 }
 0x4d4 PF: > { %s1539_s27 = sshll.u32 %s1901_s28, 3  ;;  %s1301_s4 = sshll.u32 %s2189_s18, 4  ;;  %s1302_s4 = int_to_ptr.vmem [resolvable:$true] %s1301_s4 }
 0x4d5   : > { %s1299_s14 = scalar_lea.hbm %s2569_s5, %s1539_s27  ;;  %s2597_s6 = sld [smem:[#allocation34_spill]] }
 0x4d6   : > { %s1303_s23 = sshll.u32 %s1299_s14, 4  ;;  %s1284_s17 = scalar_lea.sflag [#allocation10], %s2180_s8  ;;  %s1304_s23 = int_to_ptr.hbm [resolvable:$true] %s1303_s23 }
 0x4d7   : > { %s1769_s19 = sshra.s32 %s1304_s23, 4  ;;  %s1775_s12 = scalar_lea.hbm %s2569_s5, 16  ;;  %s1770_s19 = int_to_ptr.hbm [resolvable:$true] %s1769_s19 }
 0x4d8   : > { %s1771_s13 = scalar_lea.hbm %s1770_s19, 8  ;;  %p1776_p1 = scmp.lt.s32.totalorder %s1770_s19, %s2569_s5 }
 0x4d9   : > { %p1772_p11 = scmp.ne.s32.totalorder %s1770_s19, %s1771_s13  ;;  %p1777_p2 = scmp.lt.s32.totalorder %s1775_s12, %s1771_s13 }
 0x4db   : > { %s1313_s16 = scalar_lea.hbm %s2597_s6, %s1539_s27  ;;  %p1773_p13 = pnand %p1772_p11, %p2054_p12 }
 0x4dc   : > { %p1778_p5 = por %p1777_p2, %p1776_p1 }
 0x4dd   : > { %p1774_p0 = pneg %p1773_p13 }
 0x4df   : > { %p1779_p8 = pnand %p1778_p5, %p1774_p0 }
 0x4e1   : > { %1782 = shalt.err (!%p1779_p8)
}
 0x4e2   : > { %1559 = dma.vmem_to_hbm [thread:$0]  (%p2054_p12), %s1302_s4, 128, %s1304_s23, %s1284_s17  }
 0x4e3   : > { %s1316_s24 = sshll.u32 %s1313_s16, 4  ;;  %s1314_s27 = sshll.u32 %s2191_s15, 4  ;;  %s1317_s24 = int_to_ptr.hbm [resolvable:$true] %s1316_s24  ;;  %s1315_s27 = int_to_ptr.vmem [resolvable:$true] %s1314_s27 }
 0x4e4   : > { %s1289_s1 = scalar_lea.sflag [#allocation16], %s2180_s8  ;;  %s1797_s2 = sshra.s32 %s1317_s24, 4  ;;  %s1798_s2 = int_to_ptr.hbm [resolvable:$true] %s1797_s2 }
 0x4e5   : > { %s1799_s14 = scalar_lea.hbm %s1798_s2, 16  ;;  %s1803_s19 = scalar_lea.hbm %s2597_s6, 32 }
 0x4e6   : > { %p1800_p9 = scmp.ne.s32.totalorder %s1798_s2, %s1799_s14  ;;  %p1804_p6 = scmp.lt.s32.totalorder %s1798_s2, %s2597_s6 }
 0x4e7   : > { %p1805_p7 = scmp.lt.s32.totalorder %s1803_s19, %s1799_s14 }
 0x4e8   : > { %p1801_p10 = pnand %p1800_p9, %p2054_p12 }
 0x4e9   : > { %p1806_p11 = por %p1805_p7, %p1804_p6 }
 0x4ea   : > { %p1802_p3 = pneg %p1801_p10 }
 0x4ec   : > { %p1807_p13 = pnand %p1806_p11, %p1802_p3 }
 0x4ee   : > { %1810 = shalt.err (!%p1807_p13)
}
 0x4ef   : > { %s1928_s8 = smov 128   ;;  %s1929_s15 = smov 256  }
 0x4f0   : > { %s1930_s4 = smov 8  }
 0x4f1   : > { %1560 = dma.vmem_to_hbm [thread:$0]  (%p2054_p12), %s1315_s27, 256, %s1317_s24, %s1289_s1, %s1928_s8, %s1929_s15, %s1930_s4  }
 0x4f2 PF: > { %s2598_s23 = sld [smem:[#allocation24_spill]]  ;;  %p1576_p0 = scmp.ge.s32.totalorder %s1913_s7, 2 }
 0x4f4   : > { %p1568_p1 = pnand %p1576_p0, %p2068_p4 }
 0x4f6   : > { %p1569_p2 = pneg %p1568_p1 }
 0x4f8   : > { %s1331_s17 = sand.u32 1, %s2598_s23  }
 0x4f9   : > { %s1332_s10 = scalar_lea.sflag [#allocation10], %s1331_s17 }
 0x4fa   : > { %1864 = dma.done.wait (%p1569_p2), %s1332_s10, 128  }
 0x4fb   : > { %1866 = vsyncadd (%p1569_p2), %s1332_s10, 4294967168  ;;  %s1342_s12 = scalar_lea.sflag [#allocation16], %s1331_s17 }
 0x4fc   : > { %1868 = dma.done.wait (%p1569_p2), %s1342_s12, 256  }
 0x4fd   : > { %1870 = vsyncadd (%p1569_p2), %s1342_s12, 4294967040  ;;  %s27_s7 = sadd.s32 1, %s1913_s7   ;;  %s2600_s20 = sld [smem:[#allocation25_spill]] }
 0x4fe   : > { %p24_p5 = scmp.ge.s32.totalorder %s27_s7, 6   ;;  %s2601_s23 = sld [smem:[#allocation28_spill]] }
 0x4ff   : > { %s2602_s18 = sld [smem:[#allocation29_spill]]  ;;  %s2605_s21 = smov %s1877_s22 }
 0x500   : > { %s2603_s11 = sld [smem:[#allocation26_spill]]  ;;  %s2607_s24 = smov %s1889_s25 }
 0x501   : > { %s2604_s1 = sld [smem:[#allocation27_spill]]  ;;  %s2608_s25 = smov %s1893_s26 }
 0x502   : > { %s2610_s27 = smov %s1905_s29  ;;  %s2611_s28 = smov %s1909_s30 }
 0x503   : > { %s2606_s22 = smov %s2600_s20  ;;  %26 = sbr.rel (!%p24_p5) target bundleno = 17 (0x11), region = 215 }
 0x505   : > { %s2609_s26 = smov %s2602_s18 }
 0x506   : > { %s2612_s29 = smov %s2603_s11 }
 0x507   : > { %s2613_s30 = smov %s2604_s1 }
 0x508   :  { %1348 = vsyncpa [#allocation9], 1 }
 0x509   :  { %1350 = vsyncpa [#allocation9 + $0x1], 1 }
 0x50a   :  { %1351 = vsyncpa [#allocation13], 1 }
 0x50b   :  { %1352 = vsyncpa [#allocation10], 1 }
 0x50c   :  { %1354 = vsyncpa [#allocation10 + $0x1], 1 }
 0x50d   :  { %1355 = vsyncpa [#allocation16], 1 }
 0x50e   :  { %1357 = vsyncpa [#allocation16 + $0x1], 1 }

</bundles_post_ra>
